<compile_context>
chip_gen: v5e
topology: v5e:2x2
jax: 0.10.0
libtpu: 0.0.40
codegen_flags: <defaults>
</compile_context>

<pallas_src>
import functools

import jax
import jax.numpy as jnp
from jax.experimental import pallas as pl
from jax.experimental.pallas import tpu as pltpu


# ---------------------------------------------------------------------------
# Pallas kernel: fused 3x3 / stride-2 / pad-1 conv (BN scale pre-folded into
# weights) + bias + ReLU.  One image per grid step, phase-decomposed flattened
# input.
# ---------------------------------------------------------------------------
def _conv3x3s2_bn_relu_kernel(ph_ref, w_ref, bias_ref, out_ref, *, ho, wo):
    # ph_ref:   (1, 4, (ho+2)*(wo+1), Cin) bf16 -- phases p[2*rpar + cpar],
    #           each is the zero-padded input subsampled at that (row, col)
    #           parity, spatially flattened row-major with row pitch wo+1.
    # w_ref:    (9, Cin, Cpad) bf16 -- tap (kh, kw) at index kh*3+kw, with the
    #           folded BN scale already multiplied in.
    # bias_ref: (1, Cpad) f32 -- folded BatchNorm bias.
    # out_ref:  (1, ho*(wo+1), Cpad) -- flattened output; column `wo` of every
    #           row is wrap-around garbage and is sliced off by the wrapper.
    wp1 = wo + 1
    m_out = ho * wp1

    acc = None
    for kh in range(3):
        for kw in range(3):
            pidx = 2 * (kh % 2) + (kw % 2)        # which parity phase (static)
            start = (kh // 2) * wp1 + (kw // 2)   # flattened halo offset (static)
            tap = ph_ref[0, pidx, start:start + m_out, :]          # (m_out, Cin)
            contrib = jnp.dot(tap, w_ref[kh * 3 + kw],
                              preferred_element_type=jnp.float32)  # MXU, f32 acc
            acc = contrib if acc is None else acc + contrib

    y = jnp.maximum(acc + bias_ref[...], 0.0)     # fused BN bias + ReLU (f32)
    out_ref[0] = y.astype(out_ref.dtype)


def _conv_pallas(ph, w9, bias, ho, wo, out_dtype):
    n, _, m_in, cin = ph.shape
    cpad = w9.shape[-1]
    m_out = ho * (wo + 1)

    kernel = functools.partial(_conv3x3s2_bn_relu_kernel, ho=ho, wo=wo)
    return pl.pallas_call(
        kernel,
        out_shape=jax.ShapeDtypeStruct((n, m_out, cpad), out_dtype),
        grid_spec=pltpu.PrefetchScalarGridSpec(
            num_scalar_prefetch=0,
            grid=(n,),
            in_specs=[
                # per-image phase block (double-buffered across batch steps)
                pl.BlockSpec((1, 4, m_in, cin), lambda b: (b, 0, 0, 0)),
                # weights / BN bias: constant index_map -> VMEM-resident
                pl.BlockSpec((9, cin, cpad), lambda b: (0, 0, 0)),
                pl.BlockSpec((1, cpad), lambda b: (0, 0)),
            ],
            out_specs=pl.BlockSpec((1, m_out, cpad), lambda b: (b, 0, 0)),
        ),
        compiler_params=pltpu.CompilerParams(
            # batch axis is independent -> shard across TensorCores (v7x megacore)
            dimension_semantics=("parallel",),
            # explicit scoped-VMEM budget with headroom; per-image blocks are a
            # few MB even at 224x224, so this fits v5e/v6e/v7x.
            vmem_limit_bytes=48 * 1024 * 1024,
        ),
    )(ph, w9, bias)


# ---------------------------------------------------------------------------
# JAX glue: phase decomposition (replaces HBM im2col) and BN folding
# ---------------------------------------------------------------------------
def _phase_decompose(x_nhwc, ho, wo):
    """Zero-pad and split NHWC input into 4 stride-2 parity phases, flattened.

    Each phase has (ho+2) x (wo+1) spatial extent (one extra zero row so the
    last tap's flattened window stays in bounds), flattened row-major.
    Returns (N, 4, (ho+2)*(wo+1), C).
    """
    n, h, w, c = x_nhwc.shape
    wp1 = wo + 1
    pad_b = 2 * ho + 3 - h   # total rows after pad: 2*ho + 4  -> ho+2 per parity
    pad_r = 2 * wo + 1 - w   # total cols after pad: 2*wo + 2  -> wo+1 per parity
    xp = jnp.pad(x_nhwc, ((0, 0), (1, pad_b), (1, pad_r), (0, 0)))
    phases = [xp[:, r::2, c0::2, :] for r in (0, 1) for c0 in (0, 1)]
    ph = jnp.stack(phases, axis=1)                       # (N, 4, ho+2, wo+1, C)
    return ph.reshape(n, 4, (ho + 2) * wp1, c)


def _conv_stage(x_nhwc, w_hwio, gamma, beta, mean, var, *, eps=1e-4,
                cout_pad=None, out_dtype=jnp.float32):
    """One Conv2d(3,2,1,bias=False) + BN(eval) + ReLU stage, NHWC in/out."""
    kh, kw, cin, cout = w_hwio.shape
    n, h, w, _ = x_nhwc.shape
    ho = (h + 2 - kh) // 2 + 1
    wo = (w + 2 - kw) // 2 + 1
    cpad = cout if cout_pad is None else cout_pad

    # bf16 operands for the MXU; halves input DMA bytes.
    ph = _phase_decompose(x_nhwc.astype(jnp.bfloat16), ho, wo)

    # Fold BN (inference) into the weights (scale) and a per-channel bias, all
    # done in f32 before the bf16 cast.
    inv = gamma * jax.lax.rsqrt(var + eps)
    w_folded = w_hwio * inv.reshape(1, 1, 1, cout)
    bias = beta - mean * inv

    w9 = w_folded.reshape(kh * kw, cin, cout)
    if cpad != cout:
        w9 = jnp.pad(w9, ((0, 0), (0, 0), (0, cpad - cout)))
        bias = jnp.pad(bias, (0, cpad - cout))
    w9 = w9.astype(jnp.bfloat16)
    bias = bias.reshape(1, cpad).astype(jnp.float32)

    out_flat = _conv_pallas(ph, w9, bias, ho, wo, out_dtype)
    # Drop the wrap-around garbage column and any channel padding.
    out = out_flat.reshape(n, ho, wo + 1, cpad)[:, :, :wo, :cout]
    return out


# ---------------------------------------------------------------------------
# PatchEmbed forward (NCHW in -> NCHW out, matching PyTorch convention)
# ---------------------------------------------------------------------------
def patch_embed_forward(x_nchw, params):
    x = jnp.transpose(x_nchw, (0, 2, 3, 1))                     # NCHW -> NHWC
    # Stage 1: 3 -> 64.  Intermediate kept bf16, natural 64 channels.
    x = _conv_stage(x, params["w1"], params["g1"], params["b1"],
                    params["m1"], params["v1"],
                    cout_pad=None, out_dtype=jnp.bfloat16)
    # Stage 2: 64 -> 96.  Cout padded to 128 for lane-dense stores, f32 out.
    x = _conv_stage(x, params["w2"], params["g2"], params["b2"],
                    params["m2"], params["v2"],
                    cout_pad=128, out_dtype=jnp.float32)
    return jnp.transpose(x, (0, 3, 1, 2))                       # NHWC -> NCHW


def init_params(key, in_chans=3, in_dim=64, dim=96):
    ks = jax.random.split(key, 8)
    return {
        # conv weights stored HWIO (kh, kw, cin, cout)
        "w1": jax.random.normal(ks[0], (3, 3, in_chans, in_dim), jnp.float32) * 0.1,
        "g1": jax.random.normal(ks[1], (in_dim,), jnp.float32) * 0.1 + 1.0,
        "b1": jax.random.normal(ks[2], (in_dim,), jnp.float32) * 0.1,
        "m1": jnp.zeros((in_dim,), jnp.float32),
        "v1": jnp.ones((in_dim,), jnp.float32),
        "w2": jax.random.normal(ks[3], (3, 3, in_dim, dim), jnp.float32) * 0.05,
        "g2": jax.random.normal(ks[4], (dim,), jnp.float32) * 0.1 + 1.0,
        "b2": jax.random.normal(ks[5], (dim,), jnp.float32) * 0.1,
        "m2": jnp.zeros((dim,), jnp.float32),
        "v2": jnp.ones((dim,), jnp.float32),
    }


# ---------------------------------------------------------------------------
# Pure-JAX reference (f32) for a correctness check
# ---------------------------------------------------------------------------
def _reference_forward(x_nchw, params, eps=1e-4):
    def stage(x, w, g, b, m, v):
        y = jax.lax.conv_general_dilated(
            x, w, window_strides=(2, 2), padding=((1, 1), (1, 1)),
            dimension_numbers=("NCHW", "HWIO", "NCHW"))
        inv = g * jax.lax.rsqrt(v + eps)
        y = y * inv[None, :, None, None] + (b - m * inv)[None, :, None, None]
        return jnp.maximum(y, 0.0)

    x = stage(x_nchw, params["w1"], params["g1"], params["b1"],
              params["m1"], params["v1"])
    x = stage(x, params["w2"], params["g2"], params["b2"],
              params["m2"], params["v2"])
    return x


if __name__ == "__main__":
    key = jax.random.PRNGKey(0)
    k_x, k_p = jax.random.split(key)

    in_chans, in_dim, dim = 3, 64, 96
    batch, spatial = 2, 16
    x = jax.random.normal(k_x, (batch, in_chans, spatial, spatial), jnp.float32)
    params = init_params(k_p, in_chans=in_chans, in_dim=in_dim, dim=dim)

    out = jax.jit(patch_embed_forward)(x, params)
    out = jax.block_until_ready(out)

    # Sanity: two stride-2 convs -> spatial / 4, channels = dim.
    assert out.shape == (batch, dim, spatial // 4, spatial // 4), out.shape
    assert bool(jnp.all(out >= 0.0))   # ReLU output is non-negative

    # Numeric check against an f32 XLA reference (kernel uses bf16 MXU operands,
    # so allow ~1% relative error).
    ref = _reference_forward(x, params)
    rel = jnp.linalg.norm(out - ref) / (jnp.linalg.norm(ref) + 1e-12)
    assert float(rel) < 2e-2, f"relative error too large: {float(rel)}"

    print("KERNEL_OK")
</pallas_src>

<mosaic_0001>
module attributes {stable_mosaic.version = 11 : i64} {
  func.func @_conv3x3s2_bn_relu_kernel(%arg0: i32, %arg1: memref<1x4x90x3xbf16, #tpu.memory_space<vmem>>, %arg2: memref<9x3x64xbf16, #tpu.memory_space<vmem>>, %arg3: memref<1x64xf32, #tpu.memory_space<vmem>>, %arg4: memref<1x72x64xbf16, #tpu.memory_space<vmem>>) attributes {dimension_semantics = [#tpu.dimension_semantics<parallel>], iteration_bounds = array<i64: 2>, scalar_prefetch = 0 : i64, scratch_operands = 0 : i64, tpu.core_type = #tpu.core_type<tc>, window_params = [{transform_indices = @transform_0, window_bounds = array<i64: 1, 4, 90, 3>}, {pipeline_mode = #tpu.pipeline_mode<synchronous>, transform_indices = @transform_1, window_bounds = array<i64: 9, 3, 64>}, {pipeline_mode = #tpu.pipeline_mode<synchronous>, transform_indices = @transform_2, window_bounds = array<i64: 1, 64>}, {transform_indices = @transform_3, window_bounds = array<i64: 1, 72, 64>}]} {
    %c0 = arith.constant 0 : index
    %c0_0 = arith.constant 0 : index
    %c0_1 = arith.constant 0 : index
    %c0_2 = arith.constant 0 : index
    %0 = vector.load %arg1[%c0, %c0_0, %c0_1, %c0_2] : memref<1x4x90x3xbf16, #tpu.memory_space<vmem>>, vector<1x1x72x3xbf16>
    %1 = vector.shape_cast %0 : vector<1x1x72x3xbf16> to vector<72x3xbf16>
    %c0_3 = arith.constant 0 : index
    %c0_4 = arith.constant 0 : index
    %c0_5 = arith.constant 0 : index
    %2 = vector.load %arg2[%c0_3, %c0_4, %c0_5] : memref<9x3x64xbf16, #tpu.memory_space<vmem>>, vector<1x3x64xbf16>
    %3 = vector.shape_cast %2 : vector<1x3x64xbf16> to vector<3x64xbf16>
    %cst = arith.constant dense<0.000000e+00> : vector<72x64xf32>
    %4 = tpu.matmul %1, %3, %cst {dimension_numbers = #tpu.dot_dimension_numbers<[1], [0], [0], [1], [0, 0, 1, 1], [], []>} : vector<72x3xbf16>, vector<3x64xbf16>, vector<72x64xf32> -> vector<72x64xf32>
    %c0_6 = arith.constant 0 : index
    %c1 = arith.constant 1 : index
    %c0_7 = arith.constant 0 : index
    %c0_8 = arith.constant 0 : index
    %5 = vector.load %arg1[%c0_6, %c1, %c0_7, %c0_8] : memref<1x4x90x3xbf16, #tpu.memory_space<vmem>>, vector<1x1x72x3xbf16>
    %6 = vector.shape_cast %5 : vector<1x1x72x3xbf16> to vector<72x3xbf16>
    %c1_9 = arith.constant 1 : index
    %c0_10 = arith.constant 0 : index
    %c0_11 = arith.constant 0 : index
    %7 = vector.load %arg2[%c1_9, %c0_10, %c0_11] : memref<9x3x64xbf16, #tpu.memory_space<vmem>>, vector<1x3x64xbf16>
    %8 = vector.shape_cast %7 : vector<1x3x64xbf16> to vector<3x64xbf16>
    %cst_12 = arith.constant dense<0.000000e+00> : vector<72x64xf32>
    %9 = tpu.matmul %6, %8, %cst_12 {dimension_numbers = #tpu.dot_dimension_numbers<[1], [0], [0], [1], [0, 0, 1, 1], [], []>} : vector<72x3xbf16>, vector<3x64xbf16>, vector<72x64xf32> -> vector<72x64xf32>
    %10 = arith.addf %4, %9 : vector<72x64xf32>
    %c0_13 = arith.constant 0 : index
    %c0_14 = arith.constant 0 : index
    %c1_15 = arith.constant 1 : index
    %c0_16 = arith.constant 0 : index
    %11 = vector.load %arg1[%c0_13, %c0_14, %c1_15, %c0_16] : memref<1x4x90x3xbf16, #tpu.memory_space<vmem>>, vector<1x1x72x3xbf16>
    %12 = vector.shape_cast %11 : vector<1x1x72x3xbf16> to vector<72x3xbf16>
    %c2 = arith.constant 2 : index
    %c0_17 = arith.constant 0 : index
    %c0_18 = arith.constant 0 : index
    %13 = vector.load %arg2[%c2, %c0_17, %c0_18] : memref<9x3x64xbf16, #tpu.memory_space<vmem>>, vector<1x3x64xbf16>
    %14 = vector.shape_cast %13 : vector<1x3x64xbf16> to vector<3x64xbf16>
    %cst_19 = arith.constant dense<0.000000e+00> : vector<72x64xf32>
    %15 = tpu.matmul %12, %14, %cst_19 {dimension_numbers = #tpu.dot_dimension_numbers<[1], [0], [0], [1], [0, 0, 1, 1], [], []>} : vector<72x3xbf16>, vector<3x64xbf16>, vector<72x64xf32> -> vector<72x64xf32>
    %16 = arith.addf %10, %15 : vector<72x64xf32>
    %c0_20 = arith.constant 0 : index
    %c2_21 = arith.constant 2 : index
    %c0_22 = arith.constant 0 : index
    %c0_23 = arith.constant 0 : index
    %17 = vector.load %arg1[%c0_20, %c2_21, %c0_22, %c0_23] : memref<1x4x90x3xbf16, #tpu.memory_space<vmem>>, vector<1x1x72x3xbf16>
    %18 = vector.shape_cast %17 : vector<1x1x72x3xbf16> to vector<72x3xbf16>
    %c3 = arith.constant 3 : index
    %c0_24 = arith.constant 0 : index
    %c0_25 = arith.constant 0 : index
    %19 = vector.load %arg2[%c3, %c0_24, %c0_25] : memref<9x3x64xbf16, #tpu.memory_space<vmem>>, vector<1x3x64xbf16>
    %20 = vector.shape_cast %19 : vector<1x3x64xbf16> to vector<3x64xbf16>
    %cst_26 = arith.constant dense<0.000000e+00> : vector<72x64xf32>
    %21 = tpu.matmul %18, %20, %cst_26 {dimension_numbers = #tpu.dot_dimension_numbers<[1], [0], [0], [1], [0, 0, 1, 1], [], []>} : vector<72x3xbf16>, vector<3x64xbf16>, vector<72x64xf32> -> vector<72x64xf32>
    %22 = arith.addf %16, %21 : vector<72x64xf32>
    %c0_27 = arith.constant 0 : index
    %c3_28 = arith.constant 3 : index
    %c0_29 = arith.constant 0 : index
    %c0_30 = arith.constant 0 : index
    %23 = vector.load %arg1[%c0_27, %c3_28, %c0_29, %c0_30] : memref<1x4x90x3xbf16, #tpu.memory_space<vmem>>, vector<1x1x72x3xbf16>
    %24 = vector.shape_cast %23 : vector<1x1x72x3xbf16> to vector<72x3xbf16>
    %c4 = arith.constant 4 : index
    %c0_31 = arith.constant 0 : index
    %c0_32 = arith.constant 0 : index
    %25 = vector.load %arg2[%c4, %c0_31, %c0_32] : memref<9x3x64xbf16, #tpu.memory_space<vmem>>, vector<1x3x64xbf16>
    %26 = vector.shape_cast %25 : vector<1x3x64xbf16> to vector<3x64xbf16>
    %cst_33 = arith.constant dense<0.000000e+00> : vector<72x64xf32>
    %27 = tpu.matmul %24, %26, %cst_33 {dimension_numbers = #tpu.dot_dimension_numbers<[1], [0], [0], [1], [0, 0, 1, 1], [], []>} : vector<72x3xbf16>, vector<3x64xbf16>, vector<72x64xf32> -> vector<72x64xf32>
    %28 = arith.addf %22, %27 : vector<72x64xf32>
    %c0_34 = arith.constant 0 : index
    %c2_35 = arith.constant 2 : index
    %c1_36 = arith.constant 1 : index
    %c0_37 = arith.constant 0 : index
    %29 = vector.load %arg1[%c0_34, %c2_35, %c1_36, %c0_37] : memref<1x4x90x3xbf16, #tpu.memory_space<vmem>>, vector<1x1x72x3xbf16>
    %30 = vector.shape_cast %29 : vector<1x1x72x3xbf16> to vector<72x3xbf16>
    %c5 = arith.constant 5 : index
    %c0_38 = arith.constant 0 : index
    %c0_39 = arith.constant 0 : index
    %31 = vector.load %arg2[%c5, %c0_38, %c0_39] : memref<9x3x64xbf16, #tpu.memory_space<vmem>>, vector<1x3x64xbf16>
    %32 = vector.shape_cast %31 : vector<1x3x64xbf16> to vector<3x64xbf16>
    %cst_40 = arith.constant dense<0.000000e+00> : vector<72x64xf32>
    %33 = tpu.matmul %30, %32, %cst_40 {dimension_numbers = #tpu.dot_dimension_numbers<[1], [0], [0], [1], [0, 0, 1, 1], [], []>} : vector<72x3xbf16>, vector<3x64xbf16>, vector<72x64xf32> -> vector<72x64xf32>
    %34 = arith.addf %28, %33 : vector<72x64xf32>
    %c0_41 = arith.constant 0 : index
    %c0_42 = arith.constant 0 : index
    %c9 = arith.constant 9 : index
    %c0_43 = arith.constant 0 : index
    %35 = vector.load %arg1[%c0_41, %c0_42, %c9, %c0_43] : memref<1x4x90x3xbf16, #tpu.memory_space<vmem>>, vector<1x1x72x3xbf16>
    %36 = vector.shape_cast %35 : vector<1x1x72x3xbf16> to vector<72x3xbf16>
    %c6 = arith.constant 6 : index
    %c0_44 = arith.constant 0 : index
    %c0_45 = arith.constant 0 : index
    %37 = vector.load %arg2[%c6, %c0_44, %c0_45] : memref<9x3x64xbf16, #tpu.memory_space<vmem>>, vector<1x3x64xbf16>
    %38 = vector.shape_cast %37 : vector<1x3x64xbf16> to vector<3x64xbf16>
    %cst_46 = arith.constant dense<0.000000e+00> : vector<72x64xf32>
    %39 = tpu.matmul %36, %38, %cst_46 {dimension_numbers = #tpu.dot_dimension_numbers<[1], [0], [0], [1], [0, 0, 1, 1], [], []>} : vector<72x3xbf16>, vector<3x64xbf16>, vector<72x64xf32> -> vector<72x64xf32>
    %40 = arith.addf %34, %39 : vector<72x64xf32>
    %c0_47 = arith.constant 0 : index
    %c1_48 = arith.constant 1 : index
    %c9_49 = arith.constant 9 : index
    %c0_50 = arith.constant 0 : index
    %41 = vector.load %arg1[%c0_47, %c1_48, %c9_49, %c0_50] : memref<1x4x90x3xbf16, #tpu.memory_space<vmem>>, vector<1x1x72x3xbf16>
    %42 = vector.shape_cast %41 : vector<1x1x72x3xbf16> to vector<72x3xbf16>
    %c7 = arith.constant 7 : index
    %c0_51 = arith.constant 0 : index
    %c0_52 = arith.constant 0 : index
    %43 = vector.load %arg2[%c7, %c0_51, %c0_52] : memref<9x3x64xbf16, #tpu.memory_space<vmem>>, vector<1x3x64xbf16>
    %44 = vector.shape_cast %43 : vector<1x3x64xbf16> to vector<3x64xbf16>
    %cst_53 = arith.constant dense<0.000000e+00> : vector<72x64xf32>
    %45 = tpu.matmul %42, %44, %cst_53 {dimension_numbers = #tpu.dot_dimension_numbers<[1], [0], [0], [1], [0, 0, 1, 1], [], []>} : vector<72x3xbf16>, vector<3x64xbf16>, vector<72x64xf32> -> vector<72x64xf32>
    %46 = arith.addf %40, %45 : vector<72x64xf32>
    %c0_54 = arith.constant 0 : index
    %c0_55 = arith.constant 0 : index
    %c10 = arith.constant 10 : index
    %c0_56 = arith.constant 0 : index
    %47 = vector.load %arg1[%c0_54, %c0_55, %c10, %c0_56] : memref<1x4x90x3xbf16, #tpu.memory_space<vmem>>, vector<1x1x72x3xbf16>
    %48 = vector.shape_cast %47 : vector<1x1x72x3xbf16> to vector<72x3xbf16>
    %c8 = arith.constant 8 : index
    %c0_57 = arith.constant 0 : index
    %c0_58 = arith.constant 0 : index
    %49 = vector.load %arg2[%c8, %c0_57, %c0_58] : memref<9x3x64xbf16, #tpu.memory_space<vmem>>, vector<1x3x64xbf16>
    %50 = vector.shape_cast %49 : vector<1x3x64xbf16> to vector<3x64xbf16>
    %cst_59 = arith.constant dense<0.000000e+00> : vector<72x64xf32>
    %51 = tpu.matmul %48, %50, %cst_59 {dimension_numbers = #tpu.dot_dimension_numbers<[1], [0], [0], [1], [0, 0, 1, 1], [], []>} : vector<72x3xbf16>, vector<3x64xbf16>, vector<72x64xf32> -> vector<72x64xf32>
    %52 = arith.addf %46, %51 : vector<72x64xf32>
    %c0_60 = arith.constant 0 : index
    %c0_61 = arith.constant 0 : index
    %53 = vector.load %arg3[%c0_60, %c0_61] : memref<1x64xf32, #tpu.memory_space<vmem>>, vector<1x64xf32>
    %54 = vector.broadcast %53 : vector<1x64xf32> to vector<72x64xf32>
    %55 = arith.addf %52, %54 : vector<72x64xf32>
    %cst_62 = arith.constant 0.000000e+00 : f32
    %56 = vector.broadcast %cst_62 : f32 to vector<72x64xf32>
    %57 = arith.maximumf %55, %56 : vector<72x64xf32>
    %58 = arith.truncf %57 : vector<72x64xf32> to vector<72x64xbf16>
    %c0_63 = arith.constant 0 : index
    %c0_64 = arith.constant 0 : index
    %c0_65 = arith.constant 0 : index
    %59 = vector.load %arg4[%c0_63, %c0_64, %c0_65] : memref<1x72x64xbf16, #tpu.memory_space<vmem>>, vector<1x72x64xbf16>
    %60 = vector.shape_cast %59 : vector<1x72x64xbf16> to vector<72x64xbf16>
    %61 = vector.shape_cast %58 : vector<72x64xbf16> to vector<1x72x64xbf16>
    tpu.vector_store %arg4[%c0_63, %c0_64, %c0_65], %61 {strides = array<i32>} : memref<1x72x64xbf16, #tpu.memory_space<vmem>>, vector<1x72x64xbf16>,
    return
  }
  func.func @transform_0(%arg0: i32) -> (i32, i32, i32, i32) {
    %c0_i32 = arith.constant 0 : i32
    %c0_i32_0 = arith.constant 0 : i32
    %c0_i32_1 = arith.constant 0 : i32
    %c0_i32_2 = arith.constant 0 : i32
    return %arg0, %c0_i32, %c0_i32_0, %c0_i32_1 : i32, i32, i32, i32
  }
  func.func @transform_1(%arg0: i32) -> (i32, i32, i32) {
    %c0_i32 = arith.constant 0 : i32
    %c0_i32_0 = arith.constant 0 : i32
    %c0_i32_1 = arith.constant 0 : i32
    %c0_i32_2 = arith.constant 0 : i32
    return %c0_i32, %c0_i32_0, %c0_i32_1 : i32, i32, i32
  }
  func.func @transform_2(%arg0: i32) -> (i32, i32) {
    %c0_i32 = arith.constant 0 : i32
    %c0_i32_0 = arith.constant 0 : i32
    %c0_i32_1 = arith.constant 0 : i32
    return %c0_i32, %c0_i32_0 : i32, i32
  }
  func.func @transform_3(%arg0: i32) -> (i32, i32, i32) {
    %c0_i32 = arith.constant 0 : i32
    %c0_i32_0 = arith.constant 0 : i32
    %c0_i32_1 = arith.constant 0 : i32
    return %arg0, %c0_i32, %c0_i32_0 : i32, i32, i32
  }
}

module attributes {stable_mosaic.version = 11 : i64} {
  func.func @_conv3x3s2_bn_relu_kernel(%arg0: i32, %arg1: memref<1x4x30x64xbf16, #tpu.memory_space<vmem>>, %arg2: memref<9x64x128xbf16, #tpu.memory_space<vmem>>, %arg3: memref<1x128xf32, #tpu.memory_space<vmem>>, %arg4: memref<1x20x128xf32, #tpu.memory_space<vmem>>) attributes {dimension_semantics = [#tpu.dimension_semantics<parallel>], iteration_bounds = array<i64: 2>, scalar_prefetch = 0 : i64, scratch_operands = 0 : i64, tpu.core_type = #tpu.core_type<tc>, window_params = [{transform_indices = @transform_0, window_bounds = array<i64: 1, 4, 30, 64>}, {pipeline_mode = #tpu.pipeline_mode<synchronous>, transform_indices = @transform_1, window_bounds = array<i64: 9, 64, 128>}, {pipeline_mode = #tpu.pipeline_mode<synchronous>, transform_indices = @transform_2, window_bounds = array<i64: 1, 128>}, {transform_indices = @transform_3, window_bounds = array<i64: 1, 20, 128>}]} {
    %c0 = arith.constant 0 : index
    %c0_0 = arith.constant 0 : index
    %c0_1 = arith.constant 0 : index
    %c0_2 = arith.constant 0 : index
    %0 = vector.load %arg1[%c0, %c0_0, %c0_1, %c0_2] : memref<1x4x30x64xbf16, #tpu.memory_space<vmem>>, vector<1x1x20x64xbf16>
    %1 = vector.shape_cast %0 : vector<1x1x20x64xbf16> to vector<20x64xbf16>
    %c0_3 = arith.constant 0 : index
    %c0_4 = arith.constant 0 : index
    %c0_5 = arith.constant 0 : index
    %2 = vector.load %arg2[%c0_3, %c0_4, %c0_5] : memref<9x64x128xbf16, #tpu.memory_space<vmem>>, vector<1x64x128xbf16>
    %3 = vector.shape_cast %2 : vector<1x64x128xbf16> to vector<64x128xbf16>
    %cst = arith.constant dense<0.000000e+00> : vector<20x128xf32>
    %4 = tpu.matmul %1, %3, %cst {dimension_numbers = #tpu.dot_dimension_numbers<[1], [0], [0], [1], [0, 0, 1, 1], [], []>} : vector<20x64xbf16>, vector<64x128xbf16>, vector<20x128xf32> -> vector<20x128xf32>
    %c0_6 = arith.constant 0 : index
    %c1 = arith.constant 1 : index
    %c0_7 = arith.constant 0 : index
    %c0_8 = arith.constant 0 : index
    %5 = vector.load %arg1[%c0_6, %c1, %c0_7, %c0_8] : memref<1x4x30x64xbf16, #tpu.memory_space<vmem>>, vector<1x1x20x64xbf16>
    %6 = vector.shape_cast %5 : vector<1x1x20x64xbf16> to vector<20x64xbf16>
    %c1_9 = arith.constant 1 : index
    %c0_10 = arith.constant 0 : index
    %c0_11 = arith.constant 0 : index
    %7 = vector.load %arg2[%c1_9, %c0_10, %c0_11] : memref<9x64x128xbf16, #tpu.memory_space<vmem>>, vector<1x64x128xbf16>
    %8 = vector.shape_cast %7 : vector<1x64x128xbf16> to vector<64x128xbf16>
    %cst_12 = arith.constant dense<0.000000e+00> : vector<20x128xf32>
    %9 = tpu.matmul %6, %8, %cst_12 {dimension_numbers = #tpu.dot_dimension_numbers<[1], [0], [0], [1], [0, 0, 1, 1], [], []>} : vector<20x64xbf16>, vector<64x128xbf16>, vector<20x128xf32> -> vector<20x128xf32>
    %10 = arith.addf %4, %9 : vector<20x128xf32>
    %c0_13 = arith.constant 0 : index
    %c0_14 = arith.constant 0 : index
    %c1_15 = arith.constant 1 : index
    %c0_16 = arith.constant 0 : index
    %11 = vector.load %arg1[%c0_13, %c0_14, %c1_15, %c0_16] : memref<1x4x30x64xbf16, #tpu.memory_space<vmem>>, vector<1x1x20x64xbf16>
    %12 = vector.shape_cast %11 : vector<1x1x20x64xbf16> to vector<20x64xbf16>
    %c2 = arith.constant 2 : index
    %c0_17 = arith.constant 0 : index
    %c0_18 = arith.constant 0 : index
    %13 = vector.load %arg2[%c2, %c0_17, %c0_18] : memref<9x64x128xbf16, #tpu.memory_space<vmem>>, vector<1x64x128xbf16>
    %14 = vector.shape_cast %13 : vector<1x64x128xbf16> to vector<64x128xbf16>
    %cst_19 = arith.constant dense<0.000000e+00> : vector<20x128xf32>
    %15 = tpu.matmul %12, %14, %cst_19 {dimension_numbers = #tpu.dot_dimension_numbers<[1], [0], [0], [1], [0, 0, 1, 1], [], []>} : vector<20x64xbf16>, vector<64x128xbf16>, vector<20x128xf32> -> vector<20x128xf32>
    %16 = arith.addf %10, %15 : vector<20x128xf32>
    %c0_20 = arith.constant 0 : index
    %c2_21 = arith.constant 2 : index
    %c0_22 = arith.constant 0 : index
    %c0_23 = arith.constant 0 : index
    %17 = vector.load %arg1[%c0_20, %c2_21, %c0_22, %c0_23] : memref<1x4x30x64xbf16, #tpu.memory_space<vmem>>, vector<1x1x20x64xbf16>
    %18 = vector.shape_cast %17 : vector<1x1x20x64xbf16> to vector<20x64xbf16>
    %c3 = arith.constant 3 : index
    %c0_24 = arith.constant 0 : index
    %c0_25 = arith.constant 0 : index
    %19 = vector.load %arg2[%c3, %c0_24, %c0_25] : memref<9x64x128xbf16, #tpu.memory_space<vmem>>, vector<1x64x128xbf16>
    %20 = vector.shape_cast %19 : vector<1x64x128xbf16> to vector<64x128xbf16>
    %cst_26 = arith.constant dense<0.000000e+00> : vector<20x128xf32>
    %21 = tpu.matmul %18, %20, %cst_26 {dimension_numbers = #tpu.dot_dimension_numbers<[1], [0], [0], [1], [0, 0, 1, 1], [], []>} : vector<20x64xbf16>, vector<64x128xbf16>, vector<20x128xf32> -> vector<20x128xf32>
    %22 = arith.addf %16, %21 : vector<20x128xf32>
    %c0_27 = arith.constant 0 : index
    %c3_28 = arith.constant 3 : index
    %c0_29 = arith.constant 0 : index
    %c0_30 = arith.constant 0 : index
    %23 = vector.load %arg1[%c0_27, %c3_28, %c0_29, %c0_30] : memref<1x4x30x64xbf16, #tpu.memory_space<vmem>>, vector<1x1x20x64xbf16>
    %24 = vector.shape_cast %23 : vector<1x1x20x64xbf16> to vector<20x64xbf16>
    %c4 = arith.constant 4 : index
    %c0_31 = arith.constant 0 : index
    %c0_32 = arith.constant 0 : index
    %25 = vector.load %arg2[%c4, %c0_31, %c0_32] : memref<9x64x128xbf16, #tpu.memory_space<vmem>>, vector<1x64x128xbf16>
    %26 = vector.shape_cast %25 : vector<1x64x128xbf16> to vector<64x128xbf16>
    %cst_33 = arith.constant dense<0.000000e+00> : vector<20x128xf32>
    %27 = tpu.matmul %24, %26, %cst_33 {dimension_numbers = #tpu.dot_dimension_numbers<[1], [0], [0], [1], [0, 0, 1, 1], [], []>} : vector<20x64xbf16>, vector<64x128xbf16>, vector<20x128xf32> -> vector<20x128xf32>
    %28 = arith.addf %22, %27 : vector<20x128xf32>
    %c0_34 = arith.constant 0 : index
    %c2_35 = arith.constant 2 : index
    %c1_36 = arith.constant 1 : index
    %c0_37 = arith.constant 0 : index
    %29 = vector.load %arg1[%c0_34, %c2_35, %c1_36, %c0_37] : memref<1x4x30x64xbf16, #tpu.memory_space<vmem>>, vector<1x1x20x64xbf16>
    %30 = vector.shape_cast %29 : vector<1x1x20x64xbf16> to vector<20x64xbf16>
    %c5 = arith.constant 5 : index
    %c0_38 = arith.constant 0 : index
    %c0_39 = arith.constant 0 : index
    %31 = vector.load %arg2[%c5, %c0_38, %c0_39] : memref<9x64x128xbf16, #tpu.memory_space<vmem>>, vector<1x64x128xbf16>
    %32 = vector.shape_cast %31 : vector<1x64x128xbf16> to vector<64x128xbf16>
    %cst_40 = arith.constant dense<0.000000e+00> : vector<20x128xf32>
    %33 = tpu.matmul %30, %32, %cst_40 {dimension_numbers = #tpu.dot_dimension_numbers<[1], [0], [0], [1], [0, 0, 1, 1], [], []>} : vector<20x64xbf16>, vector<64x128xbf16>, vector<20x128xf32> -> vector<20x128xf32>
    %34 = arith.addf %28, %33 : vector<20x128xf32>
    %c0_41 = arith.constant 0 : index
    %c0_42 = arith.constant 0 : index
    %c5_43 = arith.constant 5 : index
    %c0_44 = arith.constant 0 : index
    %35 = vector.load %arg1[%c0_41, %c0_42, %c5_43, %c0_44] : memref<1x4x30x64xbf16, #tpu.memory_space<vmem>>, vector<1x1x20x64xbf16>
    %36 = vector.shape_cast %35 : vector<1x1x20x64xbf16> to vector<20x64xbf16>
    %c6 = arith.constant 6 : index
    %c0_45 = arith.constant 0 : index
    %c0_46 = arith.constant 0 : index
    %37 = vector.load %arg2[%c6, %c0_45, %c0_46] : memref<9x64x128xbf16, #tpu.memory_space<vmem>>, vector<1x64x128xbf16>
    %38 = vector.shape_cast %37 : vector<1x64x128xbf16> to vector<64x128xbf16>
    %cst_47 = arith.constant dense<0.000000e+00> : vector<20x128xf32>
    %39 = tpu.matmul %36, %38, %cst_47 {dimension_numbers = #tpu.dot_dimension_numbers<[1], [0], [0], [1], [0, 0, 1, 1], [], []>} : vector<20x64xbf16>, vector<64x128xbf16>, vector<20x128xf32> -> vector<20x128xf32>
    %40 = arith.addf %34, %39 : vector<20x128xf32>
    %c0_48 = arith.constant 0 : index
    %c1_49 = arith.constant 1 : index
    %c5_50 = arith.constant 5 : index
    %c0_51 = arith.constant 0 : index
    %41 = vector.load %arg1[%c0_48, %c1_49, %c5_50, %c0_51] : memref<1x4x30x64xbf16, #tpu.memory_space<vmem>>, vector<1x1x20x64xbf16>
    %42 = vector.shape_cast %41 : vector<1x1x20x64xbf16> to vector<20x64xbf16>
    %c7 = arith.constant 7 : index
    %c0_52 = arith.constant 0 : index
    %c0_53 = arith.constant 0 : index
    %43 = vector.load %arg2[%c7, %c0_52, %c0_53] : memref<9x64x128xbf16, #tpu.memory_space<vmem>>, vector<1x64x128xbf16>
    %44 = vector.shape_cast %43 : vector<1x64x128xbf16> to vector<64x128xbf16>
    %cst_54 = arith.constant dense<0.000000e+00> : vector<20x128xf32>
    %45 = tpu.matmul %42, %44, %cst_54 {dimension_numbers = #tpu.dot_dimension_numbers<[1], [0], [0], [1], [0, 0, 1, 1], [], []>} : vector<20x64xbf16>, vector<64x128xbf16>, vector<20x128xf32> -> vector<20x128xf32>
    %46 = arith.addf %40, %45 : vector<20x128xf32>
    %c0_55 = arith.constant 0 : index
    %c0_56 = arith.constant 0 : index
    %c6_57 = arith.constant 6 : index
    %c0_58 = arith.constant 0 : index
    %47 = vector.load %arg1[%c0_55, %c0_56, %c6_57, %c0_58] : memref<1x4x30x64xbf16, #tpu.memory_space<vmem>>, vector<1x1x20x64xbf16>
    %48 = vector.shape_cast %47 : vector<1x1x20x64xbf16> to vector<20x64xbf16>
    %c8 = arith.constant 8 : index
    %c0_59 = arith.constant 0 : index
    %c0_60 = arith.constant 0 : index
    %49 = vector.load %arg2[%c8, %c0_59, %c0_60] : memref<9x64x128xbf16, #tpu.memory_space<vmem>>, vector<1x64x128xbf16>
    %50 = vector.shape_cast %49 : vector<1x64x128xbf16> to vector<64x128xbf16>
    %cst_61 = arith.constant dense<0.000000e+00> : vector<20x128xf32>
    %51 = tpu.matmul %48, %50, %cst_61 {dimension_numbers = #tpu.dot_dimension_numbers<[1], [0], [0], [1], [0, 0, 1, 1], [], []>} : vector<20x64xbf16>, vector<64x128xbf16>, vector<20x128xf32> -> vector<20x128xf32>
    %52 = arith.addf %46, %51 : vector<20x128xf32>
    %c0_62 = arith.constant 0 : index
    %c0_63 = arith.constant 0 : index
    %53 = vector.load %arg3[%c0_62, %c0_63] : memref<1x128xf32, #tpu.memory_space<vmem>>, vector<1x128xf32>
    %54 = vector.broadcast %53 : vector<1x128xf32> to vector<20x128xf32>
    %55 = arith.addf %52, %54 : vector<20x128xf32>
    %cst_64 = arith.constant 0.000000e+00 : f32
    %56 = vector.broadcast %cst_64 : f32 to vector<20x128xf32>
    %57 = arith.maximumf %55, %56 : vector<20x128xf32>
    %c0_65 = arith.constant 0 : index
    %c0_66 = arith.constant 0 : index
    %c0_67 = arith.constant 0 : index
    %58 = vector.load %arg4[%c0_65, %c0_66, %c0_67] : memref<1x20x128xf32, #tpu.memory_space<vmem>>, vector<1x20x128xf32>
    %59 = vector.shape_cast %58 : vector<1x20x128xf32> to vector<20x128xf32>
    %60 = vector.shape_cast %57 : vector<20x128xf32> to vector<1x20x128xf32>
    tpu.vector_store %arg4[%c0_65, %c0_66, %c0_67], %60 {strides = array<i32>} : memref<1x20x128xf32, #tpu.memory_space<vmem>>, vector<1x20x128xf32>,
    return
  }
  func.func @transform_0(%arg0: i32) -> (i32, i32, i32, i32) {
    %c0_i32 = arith.constant 0 : i32
    %c0_i32_0 = arith.constant 0 : i32
    %c0_i32_1 = arith.constant 0 : i32
    %c0_i32_2 = arith.constant 0 : i32
    return %arg0, %c0_i32, %c0_i32_0, %c0_i32_1 : i32, i32, i32, i32
  }
  func.func @transform_1(%arg0: i32) -> (i32, i32, i32) {
    %c0_i32 = arith.constant 0 : i32
    %c0_i32_0 = arith.constant 0 : i32
    %c0_i32_1 = arith.constant 0 : i32
    %c0_i32_2 = arith.constant 0 : i32
    return %c0_i32, %c0_i32_0, %c0_i32_1 : i32, i32, i32
  }
  func.func @transform_2(%arg0: i32) -> (i32, i32) {
    %c0_i32 = arith.constant 0 : i32
    %c0_i32_0 = arith.constant 0 : i32
    %c0_i32_1 = arith.constant 0 : i32
    return %c0_i32, %c0_i32_0 : i32, i32
  }
  func.func @transform_3(%arg0: i32) -> (i32, i32, i32) {
    %c0_i32 = arith.constant 0 : i32
    %c0_i32_0 = arith.constant 0 : i32
    %c0_i32_1 = arith.constant 0 : i32
    return %arg0, %c0_i32, %c0_i32_0 : i32, i32, i32
  }
}

</mosaic_0001>

<bundles_post_ra>
// kernel: patch_embed_forward.3
= control target key start
LH: loop header
LB: loop body
LE: loop exit
PB: predicated region body
PF: predicated region fallthrough
CT: control target
= control target key end

     0   :  { %s1293_s12 = smov 0   ;;  %s1492_s0 = inlined_call_operand.vmem [shape: bf16[2,4,30,64], index: 0, kind: input, shape index: {}]   ;;  %s1493_s1 = inlined_call_operand.vmem [shape: bf16[9,64,128], index: 1, kind: input, shape index: {}]   ;;  %s1494_s2 = inlined_call_operand.vmem [shape: f32[1,128], index: 2, kind: input, shape index: {}]   ;;  %s1495_s3 = inlined_call_operand.vmem [shape: f32[2,20,128], index: 3, kind: output, shape index: {}]  }
   0x1 LB: > { %s929_s13 = sadd.s32 4294967295, %s1271_s12   ;;  %p933_p0 = scmp.ge.s32.totalorder %s1271_s12, 1  ;;  %s1271_s12 = sphi %s1293_s12, %s13_s12  }
   0x2   : > { %p137_p1 = scmp.lt.s32.totalorder %s1271_s12, 3 }
   0x4   : > { %p138_p2 = pnand %p933_p0, %p137_p1 }
   0x5   : > { %p161_p3 = scmp.lt.s32.totalorder (!%p138_p2), %s929_s13, 1 }
   0x6   : > { %141 = sbr.rel (%p138_p2) target bundleno = 231 (0xe7), region = 32 }
   0xb   : > { %v1217_v0 = vld [vmem:[%s1493_s1 + $0x38] sm:$0xff]  ;;  %v1216_v3 = vld [vmem:[%s1493_s1 + $0x30] sm:$0xff]  ;;  %s1497_s13 = smov (!%p161_p3, %s929_s13), 1  ;;  %v1215_v6 = vld [vmem:[%s1493_s1 + $0x28] sm:$0xff]  ;;  %vm322_vm0 = vsmask.f32 7424 }
   0xc   : > { %v1221_v1 = vld [vmem:[%s1493_s1 + $0x58] sm:$0xff]  ;;  %239 = vmatpush.bf16.msra.mxu0 %v1217_v0  ;;  %1251 = vmatpush.bf16.msra.mxu1 %v1217_v0  ;;  %v1220_v4 = vld [vmem:[%s1493_s1 + $0x50] sm:$0xff]  ;;  %s1207_s26 = sshll.u32 %s1497_s13, 6  ;;  %v1219_v9 = vld [vmem:[%s1493_s1 + $0x48] sm:$0xff]  ;;  %vm228_vm1 = vcmask 523264   ;;  %vm806_vm3 = vcmask 1044480  }
   0xd   : > { %v1226_v2 = vld [vmem:[%s1493_s1 + $0x78] sm:$0xff]  ;;  %371 = vmatpush.bf16.msra.mxu2 %v1221_v1  ;;  %v1225_v5 = vld [vmem:[%s1493_s1 + $0x70] sm:$0xff]  ;;  %s1325_s29 = scalar_lea.vmem %s1492_s0, %s1207_s26  ;;  %v1224_v10 = vld [vmem:[%s1493_s1 + $0x68] sm:$0xff]  ;;  %vm633_vm2 = vsmask.f32 5376  ;;  %s1255_s18 = smul.u32 24, %s1497_s13 }
   0xe   : > { %443 = vmatpush.bf16.msra.mxu3 %v1226_v2  ;;  %v939_v7 = vld [vmem:[%s1325_s29 + $0x18] sm:$0x3]  ;;  %v1332_v8 = vld [vmem:[%s1325_s29] sm:$0xff]  ;;  %v309_v11 = vld [vmem:[%s1325_s29 + $0x8] sm:$0x7] }
   0xf   : > { %v320_v12 = vunpack.c.l.b16 %v309_v11  ;;  %v323_v13 = vshrl.u32 %v1332_v8, 16  ;;  %v325_v14 = vshll.u32 %v1332_v8, 16  ;;  %v201_v15 = vunpack.c.l.b16 %v939_v7  ;;  %v1214_v16 = vld [vmem:[%s1493_s1 + $0x20] sm:$0xff]  ;;  %v1212_v19 = vld [vmem:[%s1493_s1 + $0x18] sm:$0xff]  ;;  %v1213_v25 = vld [vmem:[%s1325_s29 + $0x10] sm:$0xff]  ;;  %s170_s21 = scalar_lea.vmem %s1495_s3, %s1255_s18 }
  0x10   : > { %240 = vmatpush.bf16.msra.mxu0 %v1216_v3  ;;  %1252 = vmatpush.bf16.msra.mxu1 %v1216_v3  ;;  %v1218_v20 = vld [vmem:[%s1493_s1 + $0x40] sm:$0xff]  ;;  %v1231_v21 = vld [vmem:[%s1493_s1 + $0x98] sm:$0xff]  ;;  %v1211_v29 = vld [vmem:[%s1493_s1 + $0x10] sm:$0xff] }
  0x11   : > { %372 = vmatpush.bf16.msra.mxu2 %v1220_v4  ;;  %v1346_v17 = vpack.c.b16 %v320_v12, %v320_v12  ;;  %v327_v18 = vrot.slane %v325_v14, 1  ;;  %v1223_v22 = vld [vmem:[%s1493_s1 + $0x60] sm:$0xff]  ;;  %v203_v26 = vpack.c.b16 %v201_v15, %v201_v15  ;;  %v1246_v28 = vld [vmem:[%s1493_s1 + $0xf8] sm:$0xff]  ;;  %v1230_v32 = vld [vmem:[%s1493_s1 + $0x90] sm:$0xff] }
  0x12   : > { %444 = vmatpush.bf16.msra.mxu3 %v1225_v5  ;;  %v1369_v30 = vld [vmem:[%s1325_s29 + $0x20] sm:$0xff]  ;;  %v1240_v33 = vld [vmem:[%s1493_s1 + $0xd8] sm:$0xff]  ;;  %v1245_v34 = vld [vmem:[%s1493_s1 + $0xf0] sm:$0xff] }
  0x13   : > { %v328_v23 = vor.u32 %v327_v18, %v323_v13  ;;  %v330_v24 = vshll.u32 %v1346_v17, 16  ;;  %v1210_v35 = vld [vmem:[%s1493_s1 + $0x8] sm:$0xff]  ;;  %v1239_v37 = vld [vmem:[%s1493_s1 + $0xd0] sm:$0xff]  ;;  %v1209_v39 = vld [vmem:[%s1493_s1] sm:$0xff]  ;;  %v334_v47 = vshrl.u32 %v1346_v17, 16 }
  0x14   : > { %241 = vmatpush.bf16.msra.mxu0 %v1215_v6  ;;  %1253 = vmatpush.bf16.msra.mxu1 %v1215_v6  ;;  %v1229_v36 = vld [vmem:[%s1493_s1 + $0x88] sm:$0xff]  ;;  %v1228_v40 = vld [vmem:[%s1493_s1 + $0x80] sm:$0xff]  ;;  %v1235_v41 = vld [vmem:[%s1493_s1 + $0xb8] sm:$0xff] }
  0x15   : > { %373 = vmatpush.bf16.msra.mxu2 %v1219_v9  ;;  %v332_v27 = vrot.slane %v330_v24, 1  ;;  %v1244_v38 = vld [vmem:[%s1493_s1 + $0xe8] sm:$0xff]  ;;  %v610_v43 = vld [vmem:[%s1325_s29] sm:$0xc]  ;;  %v1410_v44 = vld [vmem:[%s1325_s29 + $0x4] sm:$0xf] }
  0x16   : > { %445 = vmatpush.bf16.msra.mxu3 %v1224_v10  ;;  %v1020_v42 = vld [vmem:[%s1325_s29 + $0x28] sm:$0x3]  ;;  %v1250_v45 = vld [vmem:[%s1493_s1 + $0x118] sm:$0xff]  ;;  %v1243_v48 = vld [vmem:[%s1493_s1 + $0xe0] sm:$0xff]  ;;  %v627_v52 = vunpack.c.l.b16 %v610_v43  ;;  %v628_v53 = vunpack.c.l.b16 %v1410_v44  ;;  %v545_v43 = vshrl.u32 %v1369_v30, 16 }
  0x17   : > { %v333_v31 = vsel %vm322_vm0, %v328_v23, %v332_v27  ;;  %v1238_v46 = vld [vmem:[%s1493_s1 + $0xc8] sm:$0xff]  ;;  %v1227_v49 = vld [vmem:[%s1325_s29 + $0x30] sm:$0xff]  ;;  %v406_v50 = vunpack.c.l.b16 %v1020_v42  ;;  %v1159_v58 = vld [vmem:[%s1325_s29 + $0x18] sm:$0xf]  ;;  %v336_v60 = vor.u32 %v334_v47, %v332_v27 }
  0x18   : > { %242 = vmatpush.bf16.msra.mxu0 %v1214_v16  ;;  %1254 = vmatpush.bf16.msra.mxu1 %v1214_v16  ;;  %v1234_v51 = vld [vmem:[%s1493_s1 + $0xb0] sm:$0xff]  ;;  %v1121_v54 = vld [vmem:[%s1325_s29 + $0x8] sm:$0xf]  ;;  %v1236_v55 = vld [vmem:[%s1325_s29 + $0x8] sm:$0x10]  ;;  %v631_v0 = vpack.c.b16 %v628_v53, %v627_v52 }
  0x19   : > { %374 = vmatpush.bf16.msra.mxu2 %v1218_v20  ;;  %v1155_v56 = vld [vmem:[%s1325_s29 + $0x10] sm:$0xc]  ;;  %v1241_v57 = vld [vmem:[%s1325_s29 + $0x10] sm:$0xf0]  ;;  %v1242_v59 = vld [vmem:[%s1325_s29 + $0x18] sm:$0x10]  ;;  %v408_v62 = vpack.c.b16 %v406_v50, %v406_v50  ;;  %v1441_v1 = vor.u32 %v1236_v55, %v1121_v54 }
  0x1a   : > { %446 = vmatpush.bf16.msra.mxu3 %v1223_v22  ;;  %v1249_v61 = vld [vmem:[%s1493_s1 + $0x110] sm:$0xff]  ;;  %v1237_v63 = vld [vmem:[%s1493_s1 + $0xc0] sm:$0xff]  ;;  %v1233_v2 = vld [vmem:[%s1493_s1 + $0xa8] sm:$0xff]  ;;  %v1156_v3 = vor.u32 %v1241_v57, %v1155_v56  ;;  %v1160_v4 = vor.u32 %v1242_v59, %v1159_v58  ;;  %v635_v6 = vshrl.u32 %v631_v0, 16  ;;  %v638_v7 = vshll.u32 %v631_v0, 16 }
  0x1b   : > { %968 = vmatmul.msk.bf16.vlgmr.msra.gmra.mxu0 %vm228_vm1, %v1213_v25  ;;  %969 = vmatmul.msk.bf16.vlgmr.msra.gmra.mxu1 %vm228_vm1, %v203_v26  ;;  %v1248_v5 = vld [vmem:[%s1493_s1 + $0x108] sm:$0xff]  ;;  %v643_v9 = vshrl.u32 %v1441_v1, 16  ;;  %v1232_v14 = vld [vmem:[%s1493_s1 + $0xa0] sm:$0xff]  ;;  %v1053_v16 = vld [vmem:[%s1325_s29 + $0x38] sm:$0x3] }
  0x1c   : > { %295 = vmatpush.bf16.msrb.mxu1 %v1212_v19  ;;  %515 = vmatpush.bf16.msrb.mxu0 %v1231_v21  ;;  %v726_v10 = vshrl.u32 %v1156_v3, 16  ;;  %v729_v11 = vshll.u32 %v1156_v3, 16  ;;  %v734_v12 = vshrl.u32 %v1160_v4, 16  ;;  %v737_v13 = vshll.u32 %v1160_v4, 16  ;;  %v174_v15 = vld [vmem:[%s1325_s29 + $0x8] sm:$0x3] }
  0x1d   : > { %1016 = vmatmul.msk.bf16.vlgmr.msra.gmra.mxu2 %vm228_vm1, %v333_v31  ;;  %1049 = vmatmul.msk.bf16.vlgmr.msra.gmra.mxu3 %vm228_vm1, %v1369_v30  ;;  %v1247_v17 = vld [vmem:[%s1493_s1 + $0x100] sm:$0xff]  ;;  %v637_v18 = vrot.slane %v635_v6, 2  ;;  %v640_v19 = vrot.slane %v638_v7, 3  ;;  %v645_v20 = vrot.slane %v643_v9, 2  ;;  %v258_v26 = vunpack.c.l.b16 %v174_v15  ;;  %v1084_v31 = vld [vmem:[%s1325_s29 + $0x28] sm:$0x7] }
  0x1e   : > { %776 = vmatpush.bf16.msrb.mxu3 %v1246_v28  ;;  %685 = vmatpush.bf16.msrb.mxu2 %v1240_v33  ;;  %v728_v22 = vrot.slane %v726_v10, 2  ;;  %v731_v23 = vrot.slane %v729_v11, 3  ;;  %v736_v24 = vrot.slane %v734_v12, 2  ;;  %v739_v25 = vrot.slane %v737_v13, 3 }
  0x1f   : > { %v478_v27 = vunpack.c.l.b16 %v1053_v16  ;;  %v641_v28 = vor.u32 %v640_v19, %v637_v18 }
  0x20   : > { %296 = vmatpush.bf16.msrb.mxu1 %v1211_v29  ;;  %516 = vmatpush.bf16.msrb.mxu0 %v1230_v32  ;;  %v732_v32 = vor.u32 %v731_v23, %v728_v22  ;;  %v740_v33 = vor.u32 %v739_v25, %v736_v24 }
  0x22   : > { %777 = vmatpush.bf16.msrb.mxu3 %v1245_v34  ;;  %686 = vmatpush.bf16.msrb.mxu2 %v1239_v37  ;;  %v260_v34 = vpack.c.b16 %v258_v26, %v258_v26 }
  0x24   : > { %297 = vmatpush.bf16.msrb.mxu1 %v1210_v35  ;;  %517 = vmatpush.bf16.msrb.mxu0 %v1229_v36  ;;  %v480_v35 = vpack.c.b16 %v478_v27, %v478_v27  ;;  %v543_v36 = vunpack.c.l.b16 %v1084_v31  ;;  %v1264_v27 = vld [vmem:[%s1494_s2] ss:$0 sm:$0xff] }
  0x26   : > { %778 = vmatpush.bf16.msrb.mxu3 %v1244_v38  ;;  %687 = vmatpush.bf16.msrb.mxu2 %v1238_v46  ;;  %v793_v38 = vld [vmem:[%s1325_s29] sm:$0x8] }
  0x27   : > { %v804_v42 = vunpack.c.l.b16 %v793_v38 }
  0x28   : > { %298 = vmatpush.bf16.msrb.mxu1 %v1209_v39  ;;  %518 = vmatpush.bf16.msrb.mxu0 %v1228_v40  ;;  %v741_v39 = vsel %vm633_vm2, %v732_v32, %v740_v33  ;;  %v547_v40 = vshll.u32 %v1369_v30, 16 }
  0x29   : > { %v805_v47 = vpack.c.b16 %v628_v53, %v804_v42 }
  0x2a   : > { %779 = vmatpush.bf16.msrb.mxu3 %v1243_v48  ;;  %688 = vmatpush.bf16.msrb.mxu2 %v1237_v63 }
  0x2b   : > { %990 = vmatmul.msk.bf16.vlgmr.msrb.gmra.mxu1 %vm228_vm1, %v1332_v8  ;;  %1082 = vmatmul.msk.bf16.vlgmr.msrb.gmra.mxu0 %vm228_vm1, %v1227_v49  ;;  %v646_v8 = vshll.u32 %v1441_v1, 16  ;;  %v807_v50 = vrot.slane %v805_v47, 3 }
  0x2c   : > { %593 = vmatpush.bf16.msra.mxu1 %v1235_v41  ;;  %844 = vmatpush.bf16.msra.mxu0 %v1250_v45  ;;  %v544_v41 = vpack.c.b16 %v543_v36, %v543_v36  ;;  %v549_v45 = vrot.slane %v547_v40, 1 }
  0x2d   : > { %1017 = vmatmul.msk.bf16.gmra.mxu2 %vm228_vm1, %v336_v60  ;;  %1050 = vmatmul.msk.bf16.gmra.mxu3 %vm228_vm1, %v408_v62  ;;  %v648_v21 = vrot.slane %v646_v8, 3 }
  0x2e   : > { %v552_v46 = vshll.u32 %v544_v41, 16  ;;  %v550_v48 = vor.u32 %v549_v45, %v545_v43  ;;  %v556_v30 = vshrl.u32 %v544_v41, 16 }
  0x2f   : > { %v649_v29 = vor.u32 %v648_v21, %v645_v20 }
  0x30   : > { %594 = vmatpush.bf16.msra.mxu1 %v1234_v51  ;;  %845 = vmatpush.bf16.msra.mxu0 %v1249_v61  ;;  %v554_v49 = vrot.slane %v552_v46, 1  ;;  %v808_v51 = vrot.slane %v1441_v1, 3 }
  0x31   : > { %v650_v37 = vsel %vm633_vm2, %v641_v28, %v649_v29 }
  0x32   : > { %v555_v52 = vsel %vm322_vm0, %v550_v48, %v554_v49  ;;  %v809_v54 = vsel %vm806_vm3, %v807_v50, %v808_v51  ;;  %v558_v44 = vor.u32 %v556_v30, %v554_v49 }
  0x34   : > { %595 = vmatpush.bf16.msra.mxu1 %v1233_v2  ;;  %846 = vmatpush.bf16.msra.mxu0 %v1248_v5 }
  0x38   : > { %596 = vmatpush.bf16.msra.mxu1 %v1232_v14  ;;  %847 = vmatpush.bf16.msra.mxu0 %v1247_v17 }
  0x3b   : > { %991 = vmatmul.msk.bf16.gmra.mxu1 %vm228_vm1, %v260_v34  ;;  %1083 = vmatmul.msk.bf16.gmra.mxu0 %vm228_vm1, %v480_v35 }
  0x3d   : > { %1139 = vmatmul.msk.bf16.vlgmr.msrb.gmra.mxu2 %vm228_vm1, %v650_v37  ;;  %1177 = vmatmul.msk.bf16.vlgmr.msrb.gmra.mxu3 %vm228_vm1, %v741_v39 }
  0x4b   : > { %1109 = vmatmul.msk.bf16.vlgmr.msra.gmra.mxu1 %vm228_vm1, %v555_v52  ;;  %1203 = vmatmul.msk.bf16.vlgmr.msra.gmra.mxu0 %vm228_vm1, %v809_v54 }
  0x4d   : > { %1140 = vmatmul.msk.bf16.gmra.mxu2 %vm228_vm1, %v649_v29  ;;  %1178 = vmatmul.msk.bf16.gmra.mxu3 %vm228_vm1, %v740_v33 }
  0x5b   : > { %1110 = vmatmul.msk.bf16.gmra.mxu1 %vm228_vm1, %v558_v44  ;;  %1204 = vmatmul.msk.bf16.gmra.mxu0 %vm228_vm1, %v808_v51 }
  0x98   : > { %v244_v53 = vpop.f32.mrf.mxu0  ;;  %v249_v55 = vpop.f32.mrf.mxu1 }
  0xa0   : > { %v376_v56 = vpop.f32.mrf.mxu2  ;;  %v246_v57 = vpop.f32.mrf.mxu0 }
  0xa1   : > { %v251_v58 = vpop.f32.mrf.mxu1  ;;  %v448_v59 = vpop.f32.mrf.mxu3 }
  0xa8   : > { %v378_v60 = vpop.f32.mrf.mxu2  ;;  %v520_v62 = vpop.f32.mrf.mxu0 }
  0xa9   : > { %v300_v61 = vpop.f32.mrf.mxu1  ;;  %v450_v63 = vpop.f32.mrf.mxu3 }
  0xaa   : > { %v301_v9 = vadd.f32 %v300_v61, %v244_v53 }
  0xac   : > { %v385_v8 = vadd.f32 %v376_v56, %v301_v9 }
  0xae   : > { %v457_v14 = vadd.f32 %v448_v59, %v385_v8 }
  0xb0   : > { %v381_v0 = vpop.f32.mrf.mxu2  ;;  %v522_v2 = vpop.f32.mrf.mxu0  ;;  %v529_v16 = vadd.f32 %v520_v62, %v457_v14 }
  0xb1   : > { %v302_v1 = vpop.f32.mrf.mxu1  ;;  %v453_v3 = vpop.f32.mrf.mxu3 }
  0xb2   : > { %v303_v15 = vadd.f32 %v302_v1, %v246_v57 }
  0xb4   : > { %v386_v17 = vadd.f32 %v378_v60, %v303_v15 }
  0xb6   : > { %v458_v23 = vadd.f32 %v450_v63, %v386_v17 }
  0xb8   : > { %v383_v4 = vpop.f32.mrf.mxu2  ;;  %v525_v6 = vpop.f32.mrf.mxu0  ;;  %v530_v28 = vadd.f32 %v522_v2, %v458_v23 }
  0xb9   : > { %v305_v5 = vpop.f32.mrf.mxu1  ;;  %v455_v7 = vpop.f32.mrf.mxu3 }
  0xba   : > { %v306_v24 = vadd.f32 %v305_v5, %v249_v55 }
  0xbc   : > { %v387_v29 = vadd.f32 %v381_v0, %v306_v24 }
  0xbe   : > { %v459_v38 = vadd.f32 %v453_v3, %v387_v29 }
  0xc0   : > { %v690_v10 = vpop.f32.mrf.mxu2  ;;  %v527_v12 = vpop.f32.mrf.mxu0  ;;  %v531_v42 = vadd.f32 %v525_v6, %v459_v38 }
  0xc1   : > { %v307_v11 = vpop.f32.mrf.mxu1  ;;  %v781_v13 = vpop.f32.mrf.mxu3 }
  0xc8   : > { %v692_v18 = vpop.f32.mrf.mxu2  ;;  %v849_v20 = vpop.f32.mrf.mxu0 }
  0xc9   : > { %v598_v19 = vpop.f32.mrf.mxu1  ;;  %v783_v22 = vpop.f32.mrf.mxu3 }
  0xca   : > { %v607_v21 = vadd.f32 %v598_v19, %v529_v16 }
  0xcc   : > { %v699_v25 = vadd.f32 %v690_v10, %v607_v21 }
  0xce   : > { %v790_v26 = vadd.f32 %v781_v13, %v699_v25 }
  0xd0   : > { %v858_v31 = vadd.f32 %v849_v20, %v790_v26  ;;  %v695_v32 = vpop.f32.mrf.mxu2  ;;  %v851_v34 = vpop.f32.mrf.mxu0 }
  0xd1   : > { %v600_v33 = vpop.f32.mrf.mxu1  ;;  %v786_v37 = vpop.f32.mrf.mxu3 }
  0xd2   : > { %v865_v35 = vadd.f32 %v1264_v27, %v858_v31  ;;  %v608_v36 = vadd.f32 %v600_v33, %v530_v28 }
  0xd4   : > { %v868_v39 = vmax.f32 %v865_v35, 0.0  ;;  %v700_v40 = vadd.f32 %v692_v18, %v608_v36 }
  0xd6   : > { %871 = vst [vmem:[%s170_s21] sm:$0xff] %v868_v39  ;;  %v791_v41 = vadd.f32 %v783_v22, %v700_v40 }
  0xd8   : > { %v859_v43 = vadd.f32 %v851_v34, %v791_v41  ;;  %v697_v45 = vpop.f32.mrf.mxu2  ;;  %v854_v47 = vpop.f32.mrf.mxu0 }
  0xd9   : > { %v603_v46 = vpop.f32.mrf.mxu1  ;;  %v788_v50 = vpop.f32.mrf.mxu3 }
  0xda   : > { %v866_v48 = vadd.f32 %v1264_v27, %v859_v43  ;;  %v609_v49 = vadd.f32 %v603_v46, %v531_v42 }
  0xdc   : > { %v869_v51 = vmax.f32 %v866_v48, 0.0  ;;  %v701_v52 = vadd.f32 %v695_v32, %v609_v49 }
  0xde   : > { %872 = vst [vmem:[%s170_s21 + $0x8] sm:$0xff] %v869_v51  ;;  %v792_v54 = vadd.f32 %v786_v37, %v701_v52 }
  0xe0   : > { %v860_v30 = vadd.f32 %v854_v47, %v792_v54  ;;  %v856_v53 = vpop.f32.mrf.mxu0 }
  0xe1   : > { %v605_v44 = vpop.f32.mrf.mxu1 }
  0xe2   : > { %v867_v55 = vadd.f32 %v1264_v27, %v860_v30 }
  0xe4   : > { %v870_v56 = vmax.f32 %v867_v55, 0.0 }
  0xe6   : > { %873 = vst [vmem:[%s170_s21 + $0x10] sm:$0xf] %v870_v56 }
  0xe7 PF: > { %s13_s12 = sadd.s32 1, %s1271_s12  }
  0xe8   : > { %p10_p4 = scmp.ge.s32.totalorder %s13_s12, 4  }
  0xea   :  { %12 = sbr.rel (!%p10_p4) target bundleno = 1 (0x1), region = 73 }

// kernel: patch_embed_forward.2
= control target key start
LH: loop header
LB: loop body
LE: loop exit
PB: predicated region body
PF: predicated region fallthrough
CT: control target
= control target key end

     0   :  { %s1585_s12 = smov 0   ;;  %s1826_s0 = inlined_call_operand.vmem [shape: bf16[2,4,90,3], index: 0, kind: input, shape index: {}]   ;;  %s1827_s1 = inlined_call_operand.vmem [shape: bf16[9,3,64], index: 1, kind: input, shape index: {}]   ;;  %s1828_s2 = inlined_call_operand.vmem [shape: f32[1,64], index: 2, kind: input, shape index: {}]   ;;  %s1829_s3 = inlined_call_operand.vmem [shape: bf16[2,72,64], index: 3, kind: output, shape index: {}]  }
   0x1 LB: > { %s1254_s13 = sadd.s32 4294967295, %s1562_s12   ;;  %p1258_p0 = scmp.ge.s32.totalorder %s1562_s12, 1  ;;  %s1562_s12 = sphi %s1585_s12, %s13_s12  }
   0x2   : > { %p137_p1 = scmp.lt.s32.totalorder %s1562_s12, 3 }
   0x4   : > { %p138_p2 = pnand %p1258_p0, %p137_p1 }
   0x5   : > { %p161_p3 = scmp.lt.s32.totalorder (!%p138_p2), %s1254_s13, 1 }
   0x6   : > { %141 = sbr.rel (%p138_p2) target bundleno = 340 (0x154), region = 32 }
   0xb   : > { %v1270_v0 = vld [vmem:[%s1827_s1 + $0x2] sm:$0x3]  ;;  %vm233_vm0 = vcmask 1040384   ;;  %vm234_vm1 = vcmask 1041408   ;;  %v1564_v1 = vmov 65535   ;;  %s1831_s13 = smov (!%p161_p3, %s1254_s13), 1 }
   0xc   : > { %v235_v2 = vsel %vm233_vm0, 4294967295, %v1564_v1  ;;  %v1313_v3 = vld [vmem:[%s1827_s1 + $0x4] sm:$0x3]  ;;  %v181_v4 = vld [vmem:[%s1827_s1] sm:$0x3]  ;;  %s1541_s24 = smul.u32 192, %s1831_s13 }
   0xd   : > { %v236_v5 = vsel %vm234_vm1, %v235_v2, 0  ;;  %v1348_v6 = vld [vmem:[%s1827_s1 + $0x6] sm:$0x3]  ;;  %v1379_v7 = vld [vmem:[%s1827_s1 + $0x8] sm:$0x3]  ;;  %vm217_vm2 = vcmask 23552  }
   0xe   : > { %v238_v8 = vand.u32 %v1270_v0, %v236_v5  ;;  %v440_v9 = vand.u32 %v1313_v3, %v236_v5  ;;  %v312_v10 = vand.u32 %v236_v5, %v181_v4  ;;  %v535_v11 = vand.u32 %v1348_v6, %v236_v5  ;;  %s1614_s27 = scalar_lea.vmem %s1826_s0, %s1541_s24  ;;  %v1437_v19 = vld [vmem:[%s1827_s1 + $0xc] sm:$0x3]  ;;  %v1469_v21 = vld [vmem:[%s1827_s1 + $0xe] sm:$0x3]  ;;  %v1411_v22 = vld [vmem:[%s1827_s1 + $0xa] sm:$0x3] }
   0xf   : > { %v630_v12 = vand.u32 %v1379_v7, %v236_v5  ;;  %v1508_v13 = vld [vmem:[%s1614_s27 + $0x38] sm:$0xff]  ;;  %v1509_v14 = vld [vmem:[%s1614_s27 + $0x40] sm:$0xff]  ;;  %v1269_v15 = vld [vmem:[%s1614_s27 + $0x50] sm:$0xf]  ;;  %v902_v20 = vand.u32 %v1437_v19, %v236_v5  ;;  %v1038_v23 = vand.u32 %v1469_v21, %v236_v5  ;;  %v766_v24 = vand.u32 %v1411_v22, %v236_v5  ;;  %s1542_s11 = smul.u32 36, %s1831_s13 }
  0x10   : > { %1538 = vmatpush.bf16.msra.mxu1 %v238_v8  ;;  %1539 = vmatpush.bf16.msra.mxu2 %v238_v8  ;;  %v211_v16 = vunpack.c.l.b16 %v1269_v15  ;;  %v1507_v17 = vld [vmem:[%s1614_s27 + $0x30] sm:$0xff]  ;;  %v1510_v27 = vld [vmem:[%s1614_s27 + $0x48] sm:$0xff]  ;;  %v1503_v28 = vld [vmem:[%s1614_s27] sm:$0xff]  ;;  %vm384_vm3 = vsmask.f32 7424  ;;  %vm1088_vm4 = vcmask 1046528  }
  0x11   : > { %1540 = vmatpush.bf16.msra.mxu3 %v238_v8  ;;  %247 = vmatpush.bf16.msra.mxu0 %v238_v8  ;;  %v1495_v25 = vld [vmem:[%s1827_s1 + $0x10] sm:$0x3]  ;;  %v1511_v29 = vld [vmem:[%s1614_s27] sm:$0xff]  ;;  %v1512_v32 = vld [vmem:[%s1614_s27 + $0x8] sm:$0xff]  ;;  %s1788_s16 = scalar_lea.vmem %s1829_s3, %s1542_s11  ;;  %vm1189_vm5 = vcmask 519168  }
  0x12   : > { %v216_v18 = vpack.c.b16 %v211_v16, %v211_v16  ;;  %v1114_v26 = vand.u32 %v1495_v25, %v236_v5  ;;  %v1520_v30 = vld [vmem:[%s1614_s27 + $0x90] sm:$0xff]  ;;  %v1516_v31 = vld [vmem:[%s1614_s27 + $0x60] sm:$0xff]  ;;  %v388_v33 = vshll.u32 %v1511_v29, 16  ;;  %v386_v34 = vshrl.u32 %v1511_v29, 16  ;;  %v1504_v39 = vld [vmem:[%s1614_s27 + $0x8] sm:$0xff] }
  0x13   : > { %1288 = vmatmul.msk.bf16.vlgmr.msra.gmra.mxu1 %vm217_vm2, %v1508_v13  ;;  %1289 = vmatmul.msk.bf16.vlgmr.msra.gmra.mxu2 %vm217_vm2, %v1509_v14  ;;  %v393_v36 = vshll.u32 %v1512_v32, 16  ;;  %v1521_v41 = vld [vmem:[%s1614_s27 + $0x98] sm:$0xff]  ;;  %v1517_v42 = vld [vmem:[%s1614_s27 + $0x68] sm:$0xff]  ;;  %v1513_v43 = vld [vmem:[%s1614_s27 + $0x10] sm:$0xff]  ;;  %v397_v44 = vshrl.u32 %v1512_v32, 16 }
  0x14   : > { %449 = vmatpush.bf16.msrb.mxu2 %v440_v9  ;;  %321 = vmatpush.bf16.msrb.mxu1 %v312_v10  ;;  %v390_v35 = vrot.slane %v388_v33, 1  ;;  %v401_v45 = vshll.u32 %v1513_v43, 16  ;;  %v1505_v48 = vld [vmem:[%s1614_s27 + $0x10] sm:$0xff]  ;;  %v1522_v50 = vld [vmem:[%s1614_s27 + $0xa0] sm:$0xff]  ;;  %v1514_v52 = vld [vmem:[%s1614_s27 + $0x18] sm:$0xff]  ;;  %v405_v53 = vshrl.u32 %v1513_v43, 16 }
  0x15   : > { %544 = vmatpush.bf16.msrb.mxu3 %v535_v11  ;;  %639 = vmatpush.bf16.msrb.mxu0 %v630_v12  ;;  %v395_v38 = vrot.slane %v393_v36, 1  ;;  %v1518_v51 = vld [vmem:[%s1614_s27 + $0x70] sm:$0xff]  ;;  %v409_v54 = vshll.u32 %v1514_v52, 16  ;;  %v1506_v57 = vld [vmem:[%s1614_s27 + $0x18] sm:$0xff]  ;;  %v1523_v59 = vld [vmem:[%s1614_s27 + $0xa8] sm:$0xff]  ;;  %v413_v1 = vshrl.u32 %v1514_v52, 16 }
  0x16   : > { %1287 = vmatmul.msk.bf16.vlgmr.msra.gmra.mxu0 %vm217_vm2, %v1507_v17  ;;  %1291 = vmatmul.msk.bf16.vlgmr.msra.gmra.mxu3 %vm217_vm2, %v216_v18  ;;  %v391_v37 = vor.u32 %v390_v35, %v386_v34  ;;  %v403_v47 = vrot.slane %v401_v45, 1  ;;  %v1332_v60 = vld [vmem:[%s1614_s27 + $0x20] sm:$0xf]  ;;  %v1515_v61 = vld [vmem:[%s1614_s27 + $0x20] sm:$0x10]  ;;  %v1519_v62 = vld [vmem:[%s1614_s27 + $0x78] sm:$0xff] }
  0x17   : > { %v399_v46 = vor.u32 %v397_v44, %v395_v38  ;;  %v411_v56 = vrot.slane %v409_v54, 1  ;;  %v1333_v63 = vor.u32 %v1515_v61, %v1332_v60  ;;  %v180_v0 = vld [vmem:[%s1614_s27 + $0x20] sm:$0xf]  ;;  %v1378_v3 = vld [vmem:[%s1614_s27 + $0xb0] sm:$0xf]  ;;  %v1533_v16 = vld [vmem:[%s1614_s27 + $0x34] sm:$0xff] }
  0x18   : > { %911 = vmatpush.bf16.msra.mxu2 %v902_v20  ;;  %775 = vmatpush.bf16.msra.mxu1 %v766_v24  ;;  %v396_v40 = vsel %vm384_vm3, %v391_v37, %v395_v38  ;;  %v407_v55 = vor.u32 %v405_v53, %v403_v47  ;;  %v290_v4 = vunpack.c.l.b16 %v180_v0  ;;  %v1347_v5 = vld [vmem:[%s1614_s27 + $0x80] sm:$0xf]  ;;  %v608_v8 = vunpack.c.l.b16 %v1378_v3  ;;  %v1558_v15 = vld [vmem:[%s1614_s27 + $0x4] sm:$0xe]  ;;  %v1525_v17 = vld [vmem:[%s1614_s27 + $0x68] sm:$0xff] }
  0x19   : > { %1047 = vmatpush.bf16.msra.mxu3 %v1038_v23  ;;  %1123 = vmatpush.bf16.msra.mxu0 %v1114_v26  ;;  %v404_v49 = vsel %vm384_vm3, %v399_v46, %v403_v47  ;;  %v417_v2 = vshll.u32 %v1333_v63, 16  ;;  %v415_v6 = vor.u32 %v413_v1, %v411_v56  ;;  %v513_v9 = vunpack.c.l.b16 %v1347_v5  ;;  %v1524_v12 = vld [vmem:[%s1614_s27 + $0x60] sm:$0xff]  ;;  %v1557_v20 = vld [vmem:[%s1614_s27 + $0x4] sm:$0xf0]  ;;  %v1700_v52 = vld [vmem:[%s1614_s27 + $0x14] sm:$0xff] }
  0x1a   : > { %v412_v58 = vsel %vm384_vm3, %v407_v55, %v411_v56  ;;  %v295_v10 = vpack.c.b16 %v290_v4, %v290_v4  ;;  %v613_v13 = vpack.c.b16 %v608_v8, %v608_v8  ;;  %v714_v18 = vshll.u32 %v1524_v12, 16  ;;  %v810_v19 = vld [vmem:[%s1614_s27 + $0x4] sm:$0xff]   ;;  %v1534_v21 = vld [vmem:[%s1614_s27 + $0x3c] sm:$0xff]  ;;  %v1536_v1 = vld [vmem:[%s1614_s27 + $0x4c] sm:$0xff] }
  0x1b   : > { %v419_v7 = vrot.slane %v417_v2, 1  ;;  %v518_v14 = vpack.c.b16 %v513_v9, %v513_v9  ;;  %v986_v22 = vshll.u32 %v1533_v16, 16  ;;  %v712_v23 = vshrl.u32 %v1524_v12, 16  ;;  %v1535_v45 = vld [vmem:[%s1614_s27 + $0x44] sm:$0xff]  ;;  %v1527_v0 = vld [vmem:[%s1614_s27 + $0x78] sm:$0xff] }
  0x1c   : > { %v716_v24 = vrot.slane %v714_v18, 1  ;;  %v719_v25 = vshll.u32 %v1525_v17, 16  ;;  %v1559_v26 = vor.u32 %v1558_v15, %v1557_v20  ;;  %v850_v43 = vshll.u32 %v810_v19, 16  ;;  %v1715_v8 = vld [vmem:[%s1614_s27 + $0x1c] sm:$0xff]  ;;  %v1528_v20 = vld [vmem:[%s1614_s27 + $0x80] sm:$0x10] }
  0x1d   : > { %v420_v11 = vsel %vm384_vm3, %v415_v6, %v419_v7  ;;  %v988_v29 = vrot.slane %v986_v22, 1  ;;  %v723_v44 = vshrl.u32 %v1525_v17, 16  ;;  %v848_v47 = vshrl.u32 %v810_v19, 16  ;;  %v1430_v19 = vld [vmem:[%s1614_s27 + $0x80] sm:$0xf] }
  0x1e   : > { %v717_v32 = vor.u32 %v716_v24, %v712_v23  ;;  %v721_v33 = vrot.slane %v719_v25, 1  ;;  %v1089_v34 = vrot.slane %v1559_v26, 1  ;;  %v735_v3 = vshll.u32 %v1527_v0, 16  ;;  %v1488_v25 = vld [vmem:[%s1614_s27 + $0x54] sm:$0xf] }
  0x1f   : > { %v863_v5 = vshll.u32 %v1700_v52, 16  ;;  %v1003_v6 = vshrl.u32 %v1535_v45, 16  ;;  %v1431_v24 = vor.u32 %v1528_v20, %v1430_v19  ;;  %v1537_v26 = vld [vmem:[%s1614_s27 + $0x54] sm:$0x10] }
  0x20   : > { %v725_v53 = vor.u32 %v723_v44, %v721_v33 }
  0x21   : > { %v865_v12 = vrot.slane %v863_v5, 1 }
  0x23   : > { %1290 = vmatmul.msk.bf16.gmra.mxu2 %vm217_vm2, %v1510_v27  ;;  %1308 = vmatmul.msk.bf16.vlgmr.msrb.gmra.mxu1 %vm217_vm2, %v1503_v28  ;;  %v421_v27 = vshrl.u32 %v1333_v63, 16  ;;  %v984_v28 = vshrl.u32 %v1533_v16, 16 }
  0x25   : > { %v423_v36 = vor.u32 %v421_v27, %v419_v7  ;;  %v989_v37 = vor.u32 %v988_v29, %v984_v28  ;;  %v1007_v7 = vshll.u32 %v1536_v1, 16  ;;  %v739_v28 = vshrl.u32 %v1527_v0, 16 }
  0x26   : > { %1396 = vmatmul.msk.bf16.vlgmr.msrb.gmra.mxu0 %vm217_vm2, %v1520_v30  ;;  %1365 = vmatmul.msk.bf16.vlgmr.msrb.gmra.mxu3 %vm217_vm2, %v1516_v31  ;;  %v991_v30 = vshll.u32 %v1534_v21, 16  ;;  %v1529_v31 = vld [vmem:[%s1614_s27 + $0xc] sm:$0xff]  ;;  %v743_v29 = vshll.u32 %v1431_v24, 16  ;;  %v747_v0 = vshrl.u32 %v1431_v24, 16 }
  0x27   : > { %v1090_v35 = vrot.slane %v1529_v31, 1  ;;  %v859_v4 = vshrl.u32 %v1529_v31, 16  ;;  %v1009_v15 = vrot.slane %v1007_v7, 1 }
  0x28   : > { %v993_v38 = vrot.slane %v991_v30, 1  ;;  %v1489_v30 = vor.u32 %v1537_v26, %v1488_v25 }
  0x33   : > { %1309 = vmatmul.msk.bf16.gmra.mxu1 %vm217_vm2, %v1504_v39  ;;  %1334 = vmatmul.msk.bf16.vlgmr.msrb.gmra.mxu2 %vm217_vm2, %v396_v40  ;;  %v722_v39 = vsel %vm384_vm3, %v717_v32, %v721_v33  ;;  %v1091_v40 = vsel %vm1088_vm4, %v1089_v34, %v1090_v35  ;;  %v867_v32 = vshrl.u32 %v1700_v52, 16  ;;  %v871_v33 = vshll.u32 %v1715_v8, 16  ;;  %v1452_v34 = vld [vmem:[%s1614_s27 + $0x24] sm:$0xf] }
  0x35   : > { %v873_v44 = vrot.slane %v871_v33, 1 }
  0x36   : > { %1397 = vmatmul.msk.bf16.gmra.mxu0 %vm217_vm2, %v1521_v41  ;;  %1366 = vmatmul.msk.bf16.gmra.mxu3 %vm217_vm2, %v1517_v42  ;;  %v994_v41 = vsel %vm384_vm3, %v989_v37, %v993_v38  ;;  %v1526_v42 = vld [vmem:[%s1614_s27 + $0x70] sm:$0xff] }
  0x37   : > { %v727_v46 = vshll.u32 %v1526_v42, 16  ;;  %v731_v2 = vshrl.u32 %v1526_v42, 16  ;;  %v745_v42 = vrot.slane %v743_v29, 1 }
  0x39   : > { %v729_v54 = vrot.slane %v727_v46, 1  ;;  %v749_v5 = vor.u32 %v747_v0, %v745_v42 }
  0x3b   : > { %v730_v60 = vsel %vm384_vm3, %v725_v53, %v729_v54  ;;  %v733_v9 = vor.u32 %v731_v2, %v729_v54 }
  0x43   : > { %1310 = vmatmul.msk.bf16.gmra.mxu1 %vm217_vm2, %v1505_v48  ;;  %1335 = vmatmul.msk.bf16.gmra.mxu2 %vm217_vm2, %v404_v49  ;;  %v852_v48 = vrot.slane %v850_v43, 1  ;;  %v855_v49 = vshll.u32 %v1529_v31, 16  ;;  %v869_v43 = vor.u32 %v867_v32, %v865_v12 }
  0x45   : > { %v853_v55 = vor.u32 %v852_v48, %v848_v47  ;;  %v857_v56 = vrot.slane %v855_v49, 1 }
  0x46   : > { %1398 = vmatmul.msk.bf16.gmra.mxu0 %vm217_vm2, %v1522_v50  ;;  %1367 = vmatmul.msk.bf16.gmra.mxu3 %vm217_vm2, %v1518_v51  ;;  %v995_v50 = vshrl.u32 %v1534_v21, 16  ;;  %v999_v51 = vshll.u32 %v1535_v45, 16 }
  0x47   : > { %v858_v61 = vsel %vm384_vm3, %v853_v55, %v857_v56 }
  0x53   : > { %1311 = vmatmul.msk.bf16.gmra.mxu1 %vm217_vm2, %v1506_v57  ;;  %1336 = vmatmul.msk.bf16.gmra.mxu2 %vm217_vm2, %v412_v58  ;;  %v1092_v57 = vrot.slane %v1700_v52, 1  ;;  %v997_v58 = vor.u32 %v995_v50, %v993_v38  ;;  %v1011_v38 = vshrl.u32 %v1536_v1, 16 }
  0x55   : > { %v1013_v47 = vor.u32 %v1011_v38, %v1009_v15 }
  0x56   : > { %1399 = vmatmul.msk.bf16.gmra.mxu0 %vm217_vm2, %v1523_v59  ;;  %1368 = vmatmul.msk.bf16.gmra.mxu3 %vm217_vm2, %v1519_v62  ;;  %v1001_v59 = vrot.slane %v999_v51, 1  ;;  %v1093_v62 = vsel %vm1088_vm4, %v1090_v35, %v1092_v57  ;;  %v1532_v35 = vld [vmem:[%s1614_s27 + $0x24] sm:$0x10]  ;;  %v874_v51 = vsel %vm384_vm3, %v869_v43, %v873_v44 }
  0x58   : > { %v1002_v63 = vsel %vm384_vm3, %v997_v58, %v1001_v59 }
  0x63   : > { %1312 = vmatmul.msk.bf16.gmra.mxu1 %vm217_vm2, %v295_v10  ;;  %1337 = vmatmul.msk.bf16.gmra.mxu2 %vm217_vm2, %v420_v11  ;;  %v737_v10 = vrot.slane %v735_v3, 1  ;;  %v861_v11 = vor.u32 %v859_v4, %v857_v56  ;;  %v1019_v4 = vshrl.u32 %v1489_v30, 16 }
  0x65   : > { %v738_v17 = vsel %vm384_vm3, %v733_v9, %v737_v10  ;;  %v866_v18 = vsel %vm384_vm3, %v861_v11, %v865_v12 }
  0x66   : > { %1400 = vmatmul.msk.bf16.gmra.mxu0 %vm217_vm2, %v613_v13  ;;  %1369 = vmatmul.msk.bf16.gmra.mxu3 %vm217_vm2, %v518_v14  ;;  %v1094_v13 = vrot.slane %v1715_v8, 1  ;;  %v1005_v14 = vor.u32 %v1003_v6, %v1001_v59  ;;  %v875_v59 = vshrl.u32 %v1715_v8, 16 }
  0x68   : > { %v1095_v22 = vsel %vm1088_vm4, %v1092_v57, %v1094_v13  ;;  %v1010_v23 = vsel %vm384_vm3, %v1005_v14, %v1009_v15  ;;  %v877_v1 = vor.u32 %v875_v59, %v873_v44 }
  0x73   : > { %1338 = vmatmul.msk.bf16.gmra.mxu2 %vm217_vm2, %v423_v36  ;;  %1432 = vmatmul.msk.bf16.vlgmr.msra.gmra.mxu1 %vm217_vm2, %v722_v39  ;;  %v1015_v39 = vshll.u32 %v1489_v30, 16 }
  0x75   : > { %v1017_v48 = vrot.slane %v1015_v39, 1 }
  0x76   : > { %1496 = vmatmul.msk.bf16.vlgmr.msra.gmra.mxu0 %vm217_vm2, %v1091_v40  ;;  %1490 = vmatmul.msk.bf16.vlgmr.msra.gmra.mxu3 %vm217_vm2, %v994_v41  ;;  %v1453_v40 = vor.u32 %v1532_v35, %v1452_v34  ;;  %v741_v41 = vor.u32 %v739_v28, %v737_v10 }
  0x77   : > { %v1018_v56 = vsel %vm384_vm3, %v1013_v47, %v1017_v48  ;;  %v1021_v12 = vor.u32 %v1019_v4, %v1017_v48 }
  0x78   : > { %v1096_v45 = vrot.slane %v1453_v40, 1  ;;  %v746_v50 = vsel %vm384_vm3, %v741_v41, %v745_v42  ;;  %v883_v20 = vshrl.u32 %v1453_v40, 16 }
  0x7a   : > { %v1097_v55 = vsel %vm1088_vm4, %v1094_v13, %v1096_v45 }
  0x83   : > { %1433 = vmatmul.msk.bf16.gmra.mxu1 %vm217_vm2, %v730_v60  ;;  %1454 = vmatmul.msk.bf16.vlgmr.msra.gmra.mxu2 %vm217_vm2, %v858_v61  ;;  %v879_v60 = vshll.u32 %v1453_v40, 16 }
  0x85   : > { %v881_v2 = vrot.slane %v879_v60, 1 }
  0x86   : > { %1497 = vmatmul.msk.bf16.gmra.mxu0 %vm217_vm2, %v1093_v62  ;;  %1491 = vmatmul.msk.bf16.gmra.mxu3 %vm217_vm2, %v1002_v63 }
  0x87   : > { %v882_v7 = vsel %vm384_vm3, %v877_v1, %v881_v2 }
  0x90   : > { %v1718_v16 = vpop.f32.mrf.mxu1 }
  0x93   : > { %v249_v21 = vpop.f32.mrf.mxu0  ;;  %1434 = vmatmul.msk.bf16.gmra.mxu1 %vm217_vm2, %v738_v17  ;;  %1455 = vmatmul.msk.bf16.gmra.mxu2 %vm217_vm2, %v866_v18 }
  0x96   : > { %1498 = vmatmul.msk.bf16.gmra.mxu0 %vm217_vm2, %v1095_v22  ;;  %v1731_v27 = vpop.f32.mrf.mxu2  ;;  %1492 = vmatmul.msk.bf16.gmra.mxu3 %vm217_vm2, %v1010_v23  ;;  %v885_v23 = vor.u32 %v883_v20, %v881_v2 }
  0x98   : > { %v256_v31 = vpop.f32.mrf.mxu1 }
  0x99   : > { %v1738_v36 = vpop.f32.mrf.mxu3 }
  0x9b   : > { %v251_v37 = vpop.f32.mrf.mxu0 }
  0x9e   : > { %v261_v46 = vpop.f32.mrf.mxu2 }
  0xa0   : > { %v323_v49 = vpop.f32.mrf.mxu1 }
  0xa1   : > { %v324_v52 = vadd.f32 %v323_v49, %v249_v21  ;;  %v271_v53 = vpop.f32.mrf.mxu3 }
  0xa3   : > { %v641_v54 = vpop.f32.mrf.mxu0  ;;  %1435 = vmatmul.msk.bf16.gmra.mxu1 %vm217_vm2, %v746_v50  ;;  %1456 = vmatmul.msk.bf16.gmra.mxu2 %vm217_vm2, %v874_v51 }
  0xa6   : > { %1499 = vmatmul.msk.bf16.gmra.mxu0 %vm217_vm2, %v1097_v55  ;;  %v264_v57 = vpop.f32.mrf.mxu2  ;;  %1493 = vmatmul.msk.bf16.gmra.mxu3 %vm217_vm2, %v1018_v56 }
  0xa8   : > { %v325_v58 = vpop.f32.mrf.mxu1 }
  0xa9   : > { %v326_v61 = vadd.f32 %v325_v58, %v251_v37  ;;  %v546_v62 = vpop.f32.mrf.mxu3 }
  0xab   : > { %v643_v63 = vpop.f32.mrf.mxu0 }
  0xae   : > { %v266_v3 = vpop.f32.mrf.mxu2 }
  0xb0   : > { %v328_v6 = vpop.f32.mrf.mxu1 }
  0xb1   : > { %v329_v9 = vadd.f32 %v328_v6, %v1718_v16  ;;  %v548_v10 = vpop.f32.mrf.mxu3 }
  0xb3   : > { %v646_v11 = vpop.f32.mrf.mxu0  ;;  %1436 = vmatmul.msk.bf16.gmra.mxu1 %vm217_vm2, %v749_v5  ;;  %1457 = vmatmul.msk.bf16.gmra.mxu2 %vm217_vm2, %v882_v7 }
  0xb6   : > { %1500 = vmatmul.msk.bf16.gmra.mxu0 %vm217_vm2, %v1096_v45  ;;  %v451_v8 = vpop.f32.mrf.mxu2  ;;  %1494 = vmatmul.msk.bf16.gmra.mxu3 %vm217_vm2, %v1021_v12 }
  0xb7   : > { %v475_v13 = vadd.f32 %v451_v8, %v324_v52 }
  0xb8   : > { %v330_v14 = vpop.f32.mrf.mxu1 }
  0xb9   : > { %v570_v15 = vadd.f32 %v546_v62, %v475_v13  ;;  %v331_v17 = vadd.f32 %v330_v14, %v256_v31  ;;  %v551_v18 = vpop.f32.mrf.mxu3 }
  0xbb   : > { %v648_v19 = vpop.f32.mrf.mxu0  ;;  %v1755_v16 = vadd.f32 %v641_v54, %v570_v15 }
  0xbe   : > { %v453_v21 = vpop.f32.mrf.mxu2 }
  0xbf   : > { %v476_v22 = vadd.f32 %v453_v21, %v326_v61 }
  0xc0   : > { %v333_v24 = vpop.f32.mrf.mxu1 }
  0xc1   : > { %v571_v25 = vadd.f32 %v548_v10, %v476_v22  ;;  %v334_v26 = vadd.f32 %v333_v24, %v1731_v27  ;;  %v553_v28 = vpop.f32.mrf.mxu3 }
  0xc3   : > { %v651_v29 = vpop.f32.mrf.mxu0  ;;  %1458 = vmatmul.msk.bf16.gmra.mxu2 %vm217_vm2, %v885_v23  ;;  %v1759_v30 = vadd.f32 %v643_v63, %v571_v25 }
  0xc6   : > { %v456_v32 = vpop.f32.mrf.mxu2 }
  0xc7   : > { %v477_v31 = vadd.f32 %v456_v32, %v329_v9  ;;  %v1780_v32 = vld [vmem:[%s1828_s2] ss:$0 sm:$0xff] }
  0xc8   : > { %v335_v33 = vpop.f32.mrf.mxu1 }
  0xc9   : > { %v572_v34 = vadd.f32 %v551_v18, %v477_v31  ;;  %v336_v35 = vadd.f32 %v335_v33, %v261_v46  ;;  %v556_v37 = vpop.f32.mrf.mxu3 }
  0xcb   : > { %v653_v38 = vpop.f32.mrf.mxu0  ;;  %v1761_v39 = vadd.f32 %v646_v11, %v572_v34 }
  0xce   : > { %v458_v40 = vpop.f32.mrf.mxu2 }
  0xcf   : > { %v478_v41 = vadd.f32 %v458_v40, %v331_v17 }
  0xd0   : > { %v338_v42 = vpop.f32.mrf.mxu1 }
  0xd1   : > { %v573_v43 = vadd.f32 %v553_v28, %v478_v41  ;;  %v339_v27 = vadd.f32 %v338_v42, %v264_v57  ;;  %v558_v44 = vpop.f32.mrf.mxu3 }
  0xd3   : > { %v656_v45 = vpop.f32.mrf.mxu0  ;;  %v1763_v47 = vadd.f32 %v648_v19, %v573_v43 }
  0xd6   : > { %v461_v48 = vpop.f32.mrf.mxu2 }
  0xd7   : > { %v479_v49 = vadd.f32 %v461_v48, %v334_v26 }
  0xd8   : > { %v340_v50 = vpop.f32.mrf.mxu1 }
  0xd9   : > { %v574_v51 = vadd.f32 %v556_v37, %v479_v49  ;;  %v341_v52 = vadd.f32 %v340_v50, %v266_v3  ;;  %v561_v53 = vpop.f32.mrf.mxu3 }
  0xdb   : > { %v658_v46 = vpop.f32.mrf.mxu0  ;;  %v1765_v54 = vadd.f32 %v651_v29, %v574_v51 }
  0xde   : > { %v463_v55 = vpop.f32.mrf.mxu2 }
  0xdf   : > { %v480_v56 = vadd.f32 %v463_v55, %v336_v35 }
  0xe0   : > { %v343_v58 = vpop.f32.mrf.mxu1 }
  0xe1   : > { %v575_v59 = vadd.f32 %v558_v44, %v480_v56  ;;  %v344_v60 = vadd.f32 %v343_v58, %v1738_v36  ;;  %v563_v57 = vpop.f32.mrf.mxu3 }
  0xe3   : > { %v661_v61 = vpop.f32.mrf.mxu0  ;;  %v1768_v62 = vadd.f32 %v653_v38, %v575_v59 }
  0xe6   : > { %v466_v63 = vpop.f32.mrf.mxu2 }
  0xe7   : > { %v481_v0 = vadd.f32 %v466_v63, %v339_v27 }
  0xe8   : > { %v345_v1 = vpop.f32.mrf.mxu1 }
  0xe9   : > { %v576_v2 = vadd.f32 %v561_v53, %v481_v0  ;;  %v566_v4 = vpop.f32.mrf.mxu3 }
  0xeb   : > { %v663_v3 = vpop.f32.mrf.mxu0  ;;  %v1770_v5 = vadd.f32 %v656_v45, %v576_v2 }
  0xee   : > { %v468_v6 = vpop.f32.mrf.mxu2 }
  0xef   : > { %v482_v7 = vadd.f32 %v468_v6, %v341_v52 }
  0xf0   : > { %v777_v9 = vpop.f32.mrf.mxu1 }
  0xf1   : > { %v577_v10 = vadd.f32 %v563_v57, %v482_v7  ;;  %v568_v11 = vpop.f32.mrf.mxu3  ;;  %v801_v24 = vadd.f32 %v777_v9, %v1755_v16 }
  0xf3   : > { %v1125_v12 = vpop.f32.mrf.mxu0  ;;  %v1772_v8 = vadd.f32 %v658_v46, %v577_v10 }
  0xf6   : > { %v471_v36 = vpop.f32.mrf.mxu2 }
  0xf7   : > { %v483_v13 = vadd.f32 %v471_v36, %v344_v60 }
  0xf8   : > { %v779_v14 = vpop.f32.mrf.mxu1 }
  0xf9   : > { %v578_v15 = vadd.f32 %v566_v4, %v483_v13  ;;  %v1049_v17 = vpop.f32.mrf.mxu3  ;;  %v802_v35 = vadd.f32 %v779_v14, %v1759_v30 }
  0xfb   : > { %v1127_v18 = vpop.f32.mrf.mxu0  ;;  %v1774_v19 = vadd.f32 %v661_v61, %v578_v15 }
  0xfe   : > { %v473_v20 = vpop.f32.mrf.mxu2 }
 0x100   : > { %v782_v21 = vpop.f32.mrf.mxu1 }
 0x101   : > { %v1051_v22 = vpop.f32.mrf.mxu3  ;;  %v803_v45 = vadd.f32 %v782_v21, %v1761_v39 }
 0x103   : > { %v1130_v23 = vpop.f32.mrf.mxu0 }
 0x106   : > { %v913_v25 = vpop.f32.mrf.mxu2 }
 0x107   : > { %v937_v26 = vadd.f32 %v913_v25, %v801_v24 }
 0x108   : > { %v784_v28 = vpop.f32.mrf.mxu1 }
 0x109   : > { %v1073_v29 = vadd.f32 %v1049_v17, %v937_v26  ;;  %v1054_v31 = vpop.f32.mrf.mxu3  ;;  %v804_v59 = vadd.f32 %v784_v28, %v1763_v47 }
 0x10b   : > { %v1132_v33 = vpop.f32.mrf.mxu0  ;;  %v1149_v34 = vadd.f32 %v1125_v12, %v1073_v29 }
 0x10d   : > { %v1162_v37 = vadd.f32 %v1780_v32, %v1149_v34 }
 0x10e   : > { %v915_v38 = vpop.f32.mrf.mxu2 }
 0x10f   : > { %v1171_v40 = vmax.f32 %v1162_v37, 0.0  ;;  %v938_v16 = vadd.f32 %v915_v38, %v802_v35 }
 0x110   : > { %v787_v41 = vpop.f32.mrf.mxu1 }
 0x111   : > { %v1180_v42 = vpack.c.bf16 %v1171_v40, %v1171_v40  ;;  %v1074_v43 = vadd.f32 %v1051_v22, %v938_v16  ;;  %v1056_v27 = vpop.f32.mrf.mxu3  ;;  %v805_v6 = vadd.f32 %v787_v41, %v1765_v54 }
 0x113   : > { %v1135_v44 = vpop.f32.mrf.mxu0  ;;  %1190 = vst.msk [vmem:[%s1788_s16] sm:$0xf] %vm1189_vm5, %v1180_v42  ;;  %v1150_v30 = vadd.f32 %v1127_v18, %v1074_v43 }
 0x115   : > { %v1163_v48 = vadd.f32 %v1780_v32, %v1150_v30 }
 0x116   : > { %v918_v49 = vpop.f32.mrf.mxu2 }
 0x117   : > { %v1172_v50 = vmax.f32 %v1163_v48, 0.0  ;;  %v939_v51 = vadd.f32 %v918_v49, %v803_v45 }
 0x118   : > { %v789_v52 = vpop.f32.mrf.mxu1 }
 0x119   : > { %v1181_v53 = vpack.c.bf16 %v1172_v50, %v1172_v50  ;;  %v1075_v46 = vadd.f32 %v1054_v31, %v939_v51  ;;  %v1059_v55 = vpop.f32.mrf.mxu3  ;;  %v806_v17 = vadd.f32 %v789_v52, %v1768_v62 }
 0x11b   : > { %v1137_v56 = vpop.f32.mrf.mxu0  ;;  %1191 = vst.msk [vmem:[%s1788_s16 + $0x4] sm:$0xf] %vm1189_vm5, %v1181_v53  ;;  %v1151_v58 = vadd.f32 %v1130_v23, %v1075_v46 }
 0x11d   : > { %v1164_v60 = vadd.f32 %v1780_v32, %v1151_v58 }
 0x11e   : > { %v920_v57 = vpop.f32.mrf.mxu2 }
 0x11f   : > { %v1173_v39 = vmax.f32 %v1164_v60, 0.0  ;;  %v940_v61 = vadd.f32 %v920_v57, %v804_v59 }
 0x120   : > { %v792_v63 = vpop.f32.mrf.mxu1 }
 0x121   : > { %v1182_v0 = vpack.c.bf16 %v1173_v39, %v1173_v39  ;;  %v1076_v1 = vadd.f32 %v1056_v27, %v940_v61  ;;  %v1061_v2 = vpop.f32.mrf.mxu3  ;;  %v807_v29 = vadd.f32 %v792_v63, %v1770_v5 }
 0x123   : > { %v1140_v4 = vpop.f32.mrf.mxu0  ;;  %1192 = vst.msk [vmem:[%s1788_s16 + $0x8] sm:$0xf] %vm1189_vm5, %v1182_v0  ;;  %v1152_v3 = vadd.f32 %v1132_v33, %v1076_v1 }
 0x125   : > { %v1165_v7 = vadd.f32 %v1780_v32, %v1152_v3 }
 0x126   : > { %v923_v9 = vpop.f32.mrf.mxu2 }
 0x127   : > { %v1174_v47 = vmax.f32 %v1165_v7, 0.0  ;;  %v941_v10 = vadd.f32 %v923_v9, %v805_v6 }
 0x128   : > { %v794_v11 = vpop.f32.mrf.mxu1 }
 0x129   : > { %v1183_v12 = vpack.c.bf16 %v1174_v47, %v1174_v47  ;;  %v1077_v36 = vadd.f32 %v1059_v55, %v941_v10  ;;  %v1064_v13 = vpop.f32.mrf.mxu3  ;;  %v808_v42 = vadd.f32 %v794_v11, %v1772_v8 }
 0x12b   : > { %v1142_v14 = vpop.f32.mrf.mxu0  ;;  %1193 = vst.msk [vmem:[%s1788_s16 + $0xc] sm:$0xf] %vm1189_vm5, %v1183_v12  ;;  %v1153_v15 = vadd.f32 %v1135_v44, %v1077_v36 }
 0x12d   : > { %v1166_v18 = vadd.f32 %v1780_v32, %v1153_v15 }
 0x12e   : > { %v925_v20 = vpop.f32.mrf.mxu2 }
 0x12f   : > { %v1175_v54 = vmax.f32 %v1166_v18, 0.0  ;;  %v942_v21 = vadd.f32 %v925_v20, %v806_v17 }
 0x130   : > { %v797_v22 = vpop.f32.mrf.mxu1 }
 0x131   : > { %v1184_v23 = vpack.c.bf16 %v1175_v54, %v1175_v54  ;;  %v1078_v24 = vadd.f32 %v1061_v2, %v942_v21  ;;  %v1066_v25 = vpop.f32.mrf.mxu3  ;;  %v809_v50 = vadd.f32 %v797_v22, %v1774_v19 }
 0x133   : > { %v1145_v26 = vpop.f32.mrf.mxu0  ;;  %1194 = vst.msk [vmem:[%s1788_s16 + $0x10] sm:$0xf] %vm1189_vm5, %v1184_v23  ;;  %v1154_v28 = vadd.f32 %v1137_v56, %v1078_v24 }
 0x135   : > { %v1167_v31 = vadd.f32 %v1780_v32, %v1154_v28 }
 0x136   : > { %v928_v33 = vpop.f32.mrf.mxu2 }
 0x137   : > { %v1176_v62 = vmax.f32 %v1167_v31, 0.0  ;;  %v943_v34 = vadd.f32 %v928_v33, %v807_v29 }
 0x138   : > { %v799_v35 = vpop.f32.mrf.mxu1 }
 0x139   : > { %v1185_v37 = vpack.c.bf16 %v1176_v62, %v1176_v62  ;;  %v1079_v38 = vadd.f32 %v1064_v13, %v943_v34  ;;  %v1069_v40 = vpop.f32.mrf.mxu3 }
 0x13b   : > { %v1147_v16 = vpop.f32.mrf.mxu0  ;;  %1195 = vst.msk [vmem:[%s1788_s16 + $0x14] sm:$0xf] %vm1189_vm5, %v1185_v37  ;;  %v1155_v41 = vadd.f32 %v1140_v4, %v1079_v38 }
 0x13d   : > { %v1168_v43 = vadd.f32 %v1780_v32, %v1155_v41 }
 0x13e   : > { %v930_v5 = vpop.f32.mrf.mxu2 }
 0x13f   : > { %v1177_v27 = vmax.f32 %v1168_v43, 0.0  ;;  %v944_v44 = vadd.f32 %v930_v5, %v808_v42 }
 0x141   : > { %v1186_v30 = vpack.c.bf16 %v1177_v27, %v1177_v27  ;;  %v1080_v45 = vadd.f32 %v1066_v25, %v944_v44  ;;  %v1071_v48 = vpop.f32.mrf.mxu3 }
 0x143   : > { %1196 = vst.msk [vmem:[%s1788_s16 + $0x18] sm:$0xf] %vm1189_vm5, %v1186_v30  ;;  %v1156_v49 = vadd.f32 %v1142_v14, %v1080_v45 }
 0x145   : > { %v1169_v51 = vadd.f32 %v1780_v32, %v1156_v49 }
 0x146   : > { %v933_v52 = vpop.f32.mrf.mxu2 }
 0x147   : > { %v1178_v53 = vmax.f32 %v1169_v51, 0.0  ;;  %v945_v8 = vadd.f32 %v933_v52, %v809_v50 }
 0x149   : > { %v1187_v46 = vpack.c.bf16 %v1178_v53, %v1178_v53  ;;  %v1081_v55 = vadd.f32 %v1069_v40, %v945_v8 }
 0x14b   : > { %1197 = vst.msk [vmem:[%s1788_s16 + $0x1c] sm:$0xf] %vm1189_vm5, %v1187_v46  ;;  %v1157_v56 = vadd.f32 %v1145_v26, %v1081_v55 }
 0x14d   : > { %v1170_v58 = vadd.f32 %v1780_v32, %v1157_v56 }
 0x14e   : > { %v935_v59 = vpop.f32.mrf.mxu2 }
 0x14f   : > { %v1179_v60 = vmax.f32 %v1170_v58, 0.0 }
 0x151   : > { %v1188_v57 = vpack.c.bf16 %v1179_v60, %v1179_v60 }
 0x153   : > { %1198 = vst.msk [vmem:[%s1788_s16 + $0x20] sm:$0xf] %vm1189_vm5, %v1188_v57 }
 0x154 PF: > { %s13_s12 = sadd.s32 1, %s1562_s12  }
 0x155   : > { %p10_p4 = scmp.ge.s32.totalorder %s13_s12, 4  }
 0x157   :  { %12 = sbr.rel (!%p10_p4) target bundleno = 1 (0x1), region = 73 }

</bundles_post_ra>
